<compile_context>
chip_gen: v5e
topology: v5e:2x2
jax: 0.10.0
libtpu: 0.0.40
codegen_flags: <defaults>
</compile_context>

<pallas_src>
import functools

import jax
import jax.numpy as jnp
import numpy as np
from jax import lax
from jax.experimental import pallas as pl
from jax.experimental.pallas import tpu as pltpu

_MIB = 1024 * 1024


def _round_up(x, m):
    return (x + m - 1) // m * m


def _tpu_hw_info():
    """Best-effort hardware query: (per-core VMEM bytes, dual-TensorCore chip?)."""
    vmem_bytes = 64 * _MIB                 # conservative fallback (v7x per-TC)
    two_cores = False
    try:
        info = pltpu.get_tpu_info()
        vmem_bytes = int(getattr(info, "vmem_capacity_bytes", vmem_bytes))
    except Exception:
        pass
    try:
        kind = jax.devices()[0].device_kind.lower()
        two_cores = ("v7" in kind) or ("7x" in kind)
    except Exception:
        pass
    return vmem_bytes, two_cores


def _vmem_need_bytes(tc, bt, d, g, hp, wbytes):
    x_blk = tc * bt * d * 4 * 2            # double-buffered x chunk
    att_blk = tc * bt * 1 * 4 * 2          # double-buffered att chunk
    out_blk = tc * bt * hp * 4 * 2         # double-buffered out chunk
    wih = d * g * wbytes                   # Buffered(1): single copy
    whh = hp * g * wbytes                  # Buffered(1): single copy
    bias = 2 * g * 4
    gi_scr = tc * bt * g * 4               # per-chunk input-projection scratch
    h_scr = bt * hp * 4                    # hidden carry
    return x_blk + att_blk + out_blk + wih + whh + bias + gi_scr + h_scr


def _make_gru_kernel(gru_type: str, tc: int, hp: int, n_gates: int,
                     d: int, bt: int, g: int):
    """Kernel body. grid = (batch_blocks, time_blocks); time runs sequentially,
    the hidden state is carried across time chunks in a VMEM scratch buffer."""

    def kernel(active_ref, x_ref, att_ref, wih_ref, bih_ref, whh_ref, bhh_ref,
               out_ref, gi_ref, h_ref):
        b = pl.program_id(0)
        t = pl.program_id(1)

        # hx = None in the PyTorch module -> zero init at the start of each
        # batch block's time sweep.
        @pl.when(t == 0)
        def _():
            h_ref[...] = jnp.zeros_like(h_ref)

        # Skip chunks that contain no active (unpadded) rows at all.
        @pl.when(active_ref[b, t] > 0)
        def _():
            wih = wih_ref[...]             # (D, G)  resident (Buffered(1))
            whh = whh_ref[...]             # (Hp, G) resident (Buffered(1))
            bih = bih_ref[...]             # (1, G)
            bhh = bhh_ref[...]             # (1, G)
            wdt = wih.dtype

            # Chunk-wide input projection, off the sequential path:
            #   gi = x @ W_ih^T + b_ih  for all tc timesteps in one MXU dot.
            x2d = x_ref[...].astype(wdt).reshape(tc * bt, d)
            gi2d = jnp.dot(x2d, wih, preferred_element_type=jnp.float32)
            gi_ref[...] = gi2d.reshape(tc, bt, g) + bih

            def step(s, h):
                gi = gi_ref[s]             # (bt, G)
                att = att_ref[s]           # (bt, 1)
                # TODO(synk): weight-stationary MXU (push W_hh once per chunk).
                gh = jnp.dot(h.astype(whh.dtype), whh,
                             preferred_element_type=jnp.float32) + bhh
                i_r = gi[:, :hp]
                h_r = gh[:, :hp]
                i_n = gi[:, (n_gates - 1) * hp:]
                h_n = gh[:, (n_gates - 1) * hp:]
                reset_gate = jax.nn.sigmoid(i_r + h_r)
                new_state = jnp.tanh(i_n + reset_gate * h_n)
                if gru_type == "AGRU":
                    gate = att
                else:                      # AUGRU
                    i_z = gi[:, hp:2 * hp]
                    h_z = gh[:, hp:2 * hp]
                    gate = att * jax.nn.sigmoid(i_z + h_z)
                # blend rewrite: (1 - gate)*h + gate*new == h + gate*(new - h)
                hy = h + gate * (new_state - h)
                out_ref[s] = hy.astype(out_ref.dtype)
                return hy

            h_ref[...] = lax.fori_loop(0, tc, step, h_ref[...],
                                       unroll=min(tc, 8))

    return kernel


@functools.partial(
    jax.jit,
    static_argnames=("batch_sizes", "gru_type", "tc", "bt", "use_bf16",
                     "vmem_limit"))
def _dynamic_gru_impl(packed_x, packed_att, w_ih, w_hh, b_ih, b_hh, *,
                      batch_sizes, gru_type, tc, bt, use_bf16, vmem_limit):
    T = len(batch_sizes)
    B = batch_sizes[0]
    D = packed_x.shape[-1]
    H = w_hh.shape[-1]

    Hp = _round_up(H, 128)                       # lane-dense hidden dim
    n_gates = 2 if gru_type == "AGRU" else 3     # AGRU never uses the z gate
    G = n_gates * Hp
    Bp = _round_up(B, 8)                         # sublane-aligned batch
    Tp = _round_up(T, tc)
    nt = Tp // tc
    nb = Bp // bt
    wdt = jnp.bfloat16 if use_bf16 else jnp.float32

    # ---- glue: packed -> padded (Tp, Bp, *) time-major, static slices ------
    packed_x = packed_x.astype(jnp.float32)
    packed_att = packed_att.reshape(-1).astype(jnp.float32)
    x_rows, att_rows = [], []
    off = 0
    for bs in batch_sizes:
        xt = packed_x[off:off + bs]
        at = packed_att[off:off + bs].reshape(bs, 1)
        if bs < Bp:
            xt = jnp.pad(xt, ((0, Bp - bs), (0, 0)))
            at = jnp.pad(at, ((0, Bp - bs), (0, 0)))
        x_rows.append(xt)
        att_rows.append(at)
        off += bs
    x_pad = jnp.stack(x_rows, axis=0)            # (T, Bp, D)
    att_pad = jnp.stack(att_rows, axis=0)        # (T, Bp, 1); padding att == 0
    if Tp > T:
        x_pad = jnp.pad(x_pad, ((0, Tp - T), (0, 0), (0, 0)))
        att_pad = jnp.pad(att_pad, ((0, Tp - T), (0, 0), (0, 0)))

    # ---- glue: fused, hidden-padded weights, gate order (r[, z], n) ---------
    gate_ids = (0, 2) if gru_type == "AGRU" else (0, 1, 2)
    w_ih_g = w_ih.reshape(3, H, D).astype(jnp.float32)
    w_hh_g = w_hh.reshape(3, H, H).astype(jnp.float32)
    b_ih_g = b_ih.reshape(3, H).astype(jnp.float32)
    b_hh_g = b_hh.reshape(3, H).astype(jnp.float32)

    def pad_last(m):                             # pad last axis H -> Hp with 0
        return jnp.pad(m, [(0, 0)] * (m.ndim - 1) + [(0, Hp - H)])

    wih_f = jnp.concatenate([pad_last(w_ih_g[g].T) for g in gate_ids],
                            axis=-1).astype(wdt)                       # (D, G)
    whh_f = jnp.concatenate([pad_last(w_hh_g[g].T) for g in gate_ids], axis=-1)
    whh_f = jnp.pad(whh_f, ((0, Hp - H), (0, 0))).astype(wdt)          # (Hp, G)
    bih_f = jnp.concatenate([pad_last(b_ih_g[g]) for g in gate_ids],
                            axis=-1)[None]                             # (1, G)
    bhh_f = jnp.concatenate([pad_last(b_hh_g[g]) for g in gate_ids],
                            axis=-1)[None]                             # (1, G)

    # ---- static ragged-tail activity mask (batch_sizes is non-increasing) --
    active = np.zeros((nb, nt), np.int32)
    for bi in range(nb):
        for ti in range(nt):
            t0 = ti * tc
            active[bi, ti] = int(t0 < T and batch_sizes[t0] > bi * bt)
    active = jnp.asarray(active)

    kernel = _make_gru_kernel(gru_type, tc, Hp, n_gates, D, bt, G)

    out_pad = pl.pallas_call(
        kernel,
        out_shape=jax.ShapeDtypeStruct((Tp, Bp, Hp), jnp.float32),
        grid_spec=pltpu.PrefetchScalarGridSpec(
            num_scalar_prefetch=1,                      # the activity mask
            grid=(nb, nt),
            in_specs=[
                pl.BlockSpec((tc, bt, D), lambda b, t, act: (t, b, 0)),   # x
                pl.BlockSpec((tc, bt, 1), lambda b, t, act: (t, b, 0)),   # att
                pl.BlockSpec((D, G), lambda b, t, act: (0, 0),
                             pipeline_mode=pl.Buffered(1)),               # W_ih
                pl.BlockSpec((1, G), lambda b, t, act: (0, 0),
                             pipeline_mode=pl.Buffered(1)),               # b_ih
                pl.BlockSpec((Hp, G), lambda b, t, act: (0, 0),
                             pipeline_mode=pl.Buffered(1)),               # W_hh
                pl.BlockSpec((1, G), lambda b, t, act: (0, 0),
                             pipeline_mode=pl.Buffered(1)),               # b_hh
            ],
            out_specs=pl.BlockSpec((tc, bt, Hp), lambda b, t, act: (t, b, 0)),
            scratch_shapes=[
                pltpu.VMEM((tc, bt, G), jnp.float32),   # per-chunk gi
                pltpu.VMEM((bt, Hp), jnp.float32),      # hidden carry
            ],
        ),
        compiler_params=pltpu.CompilerParams(
            dimension_semantics=("parallel", "arbitrary"),  # batch ||, time seq
            vmem_limit_bytes=vmem_limit),
    )(active, x_pad, att_pad, wih_f, bih_f, whh_f, bhh_f)

    # ---- glue: padded -> packed outputs (static slices, drop padding) ------
    outs = [out_pad[t, :bs, :H] for t, bs in enumerate(batch_sizes)]
    return jnp.concatenate(outs, axis=0)


def dynamic_gru_pallas(packed_x, packed_att, batch_sizes,
                       w_ih, w_hh, b_ih, b_hh,
                       gru_type="AGRU", time_chunk=None, batch_block=None,
                       use_bf16=False):
    """DynamicGRU.forward for a packed sequence.

    packed_x   : (total, D)   packed inputs (time-major packing, sorted batch)
    packed_att : (total,)     packed attention scores
    batch_sizes: non-increasing per-timestep batch sizes (sum == total)
    w_ih       : (3H, D) torch layout [r; z; n];  w_hh: (3H, H)
    b_ih, b_hh : (3H,)
    returns packed outputs (total, H)
    """
    batch_sizes = tuple(int(b) for b in batch_sizes)
    assert all(batch_sizes[i] >= batch_sizes[i + 1]
               for i in range(len(batch_sizes) - 1)), \
        "DynamicGRU requires a sorted packed sequence (non-increasing batch_sizes)"
    assert sum(batch_sizes) == packed_x.shape[0]

    T = len(batch_sizes)
    B = batch_sizes[0]
    D = packed_x.shape[-1]
    H = w_hh.shape[-1]
    Hp = _round_up(H, 128)
    n_gates = 2 if gru_type == "AGRU" else 3
    G = n_gates * Hp
    Bp = _round_up(B, 8)
    wbytes = 2 if use_bf16 else 4

    vmem_cap, two_cores = _tpu_hw_info()
    vmem_cap = int(0.75 * vmem_cap)          # headroom for Mosaic internals

    # Batch sharding: only pays off on dual-TensorCore chips (v7x); on
    # v5e/v6e the grid is a serial loop so splitting just shrinks the matmul.
    if batch_block is None:
        bt = Bp
        if two_cores and Bp >= 16 and (Bp // 2) % 8 == 0:
            bt = Bp // 2
    else:
        bt = max(8, min(int(batch_block), Bp))
    if Bp % bt != 0 or bt % 8 != 0:
        bt = Bp

    # Time chunk: largest candidate that comfortably fits the VMEM budget
    # (amortizes the ~0.35us/grid-step overhead with bigger DMA slabs).
    if time_chunk is None:
        tc = 1
        for cand in (32, 16, 8, 4, 2, 1):
            c = min(cand, T)
            if _vmem_need_bytes(c, bt, D, G, Hp, wbytes) <= int(0.6 * vmem_cap):
                tc = c
                break
    else:
        tc = max(1, min(int(time_chunk), T))

    need = _vmem_need_bytes(tc, bt, D, G, Hp, wbytes)
    vmem_limit = int(min(max(2 * need, 16 * _MIB), vmem_cap))

    return _dynamic_gru_impl(packed_x, packed_att, w_ih, w_hh, b_ih, b_hh,
                             batch_sizes=batch_sizes, gru_type=gru_type,
                             tc=tc, bt=bt, use_bf16=bool(use_bf16),
                             vmem_limit=vmem_limit)


def dynamic_gru_reference(packed_x, packed_att, batch_sizes,
                          w_ih, w_hh, b_ih, b_hh, gru_type="AGRU"):
    """Pure-JAX reference that mirrors the PyTorch loop exactly."""
    batch_sizes = [int(b) for b in batch_sizes]
    H = w_hh.shape[-1]
    max_b = batch_sizes[0]
    hx = jnp.zeros((max_b, H), jnp.float32)
    outputs = jnp.zeros((packed_x.shape[0], H), jnp.float32)
    begin = 0
    for batch in batch_sizes:
        x = packed_x[begin:begin + batch]
        h = hx[0:batch]
        att = packed_att[begin:begin + batch].reshape(-1, 1)
        gi = x @ w_ih.T + b_ih
        gh = h @ w_hh.T + b_hh
        i_r, i_z, i_n = jnp.split(gi, 3, axis=1)
        h_r, h_z, h_n = jnp.split(gh, 3, axis=1)
        reset_gate = jax.nn.sigmoid(i_r + h_r)
        new_state = jnp.tanh(i_n + reset_gate * h_n)
        if gru_type == "AGRU":
            hy = (1.0 - att) * h + att * new_state
        else:
            update_gate = att * jax.nn.sigmoid(i_z + h_z)
            hy = (1.0 - update_gate) * h + update_gate * new_state
        outputs = outputs.at[begin:begin + batch].set(hy)
        hx = hy
        begin += batch
    return outputs


if __name__ == "__main__":
    D, H = 16, 32
    key = jax.random.PRNGKey(0)

    def make_case(k, lengths):
        T = lengths[0]
        batch_sizes = tuple(sum(1 for L in lengths if L > t) for t in range(T))
        total = sum(batch_sizes)
        k1, k2, k3, k4, k5, k6 = jax.random.split(k, 6)
        packed_x = jax.random.normal(k1, (total, D), jnp.float32)
        packed_att = jax.random.uniform(k2, (total,), jnp.float32)
        w_ih = 0.1 * jax.random.normal(k3, (3 * H, D), jnp.float32)
        w_hh = 0.1 * jax.random.normal(k4, (3 * H, H), jnp.float32)
        b_ih = 0.1 * jax.random.normal(k5, (3 * H,), jnp.float32)
        b_hh = 0.1 * jax.random.normal(k6, (3 * H,), jnp.float32)
        return batch_sizes, packed_x, packed_att, w_ih, w_hh, b_ih, b_hh

    k1, k2 = jax.random.split(key)

    # Case 1: small sorted packed batch, both cell types, f32 path.
    bs1, x1, a1, wih1, whh1, bih1, bhh1 = make_case(k1, [8, 6, 4, 2])
    for gru_type in ("AGRU", "AUGRU"):
        out = jax.block_until_ready(
            dynamic_gru_pallas(x1, a1, bs1, wih1, whh1, bih1, bhh1,
                               gru_type=gru_type))
        ref = dynamic_gru_reference(x1, a1, bs1, wih1, whh1, bih1, bhh1,
                                    gru_type=gru_type)
        np.testing.assert_allclose(np.asarray(out), np.asarray(ref),
                                   rtol=1e-4, atol=1e-4)

    # Case 2: 16 ragged sequences with explicit batch/time blocking so the
    # multi-block grid and the ragged-tail pl.when skip path are exercised.
    lengths2 = [12, 11, 10, 9, 8, 8, 7, 6, 5, 5, 4, 3, 3, 2, 2, 1]
    bs2, x2, a2, wih2, whh2, bih2, bhh2 = make_case(k2, lengths2)
    out = jax.block_until_ready(
        dynamic_gru_pallas(x2, a2, bs2, wih2, whh2, bih2, bhh2,
                           gru_type="AUGRU", time_chunk=4, batch_block=8))
    ref = dynamic_gru_reference(x2, a2, bs2, wih2, whh2, bih2, bhh2,
                                gru_type="AUGRU")
    np.testing.assert_allclose(np.asarray(out), np.asarray(ref),
                               rtol=1e-4, atol=1e-4)

    # Case 3: opt-in bf16 weight streaming (looser tolerance by design).
    out = jax.block_until_ready(
        dynamic_gru_pallas(x1, a1, bs1, wih1, whh1, bih1, bhh1,
                           gru_type="AUGRU", use_bf16=True))
    ref = dynamic_gru_reference(x1, a1, bs1, wih1, whh1, bih1, bhh1,
                                gru_type="AUGRU")
    np.testing.assert_allclose(np.asarray(out), np.asarray(ref),
                               rtol=5e-2, atol=5e-2)

    print("KERNEL_OK")
</pallas_src>

<mosaic_0001>
module attributes {stable_mosaic.version = 11 : i64} {
  func.func @kernel(%arg0: i32, %arg1: i32, %arg2: memref<1x1xi32, #tpu.memory_space<smem>>, %arg3: memref<8x8x16xf32, #tpu.memory_space<vmem>>, %arg4: memref<8x8x1xf32, #tpu.memory_space<vmem>>, %arg5: memref<16x256xf32, #tpu.memory_space<vmem>>, %arg6: memref<1x256xf32, #tpu.memory_space<vmem>>, %arg7: memref<128x256xf32, #tpu.memory_space<vmem>>, %arg8: memref<1x256xf32, #tpu.memory_space<vmem>>, %arg9: memref<8x8x128xf32, #tpu.memory_space<vmem>>, %arg10: memref<8x8x256xf32, #tpu.memory_space<vmem>>, %arg11: memref<8x128xf32, #tpu.memory_space<vmem>>) attributes {dimension_semantics = [#tpu.dimension_semantics<parallel>, #tpu.dimension_semantics<arbitrary>], iteration_bounds = array<i64: 1, 1>, scalar_prefetch = 1 : i64, scratch_operands = 2 : i64, tpu.core_type = #tpu.core_type<tc>, window_params = [{transform_indices = @transform_0, window_bounds = array<i64: 8, 8, 16>}, {transform_indices = @transform_1, window_bounds = array<i64: 8, 8, 1>}, {pipeline_mode = #tpu.pipeline_mode<synchronous>, transform_indices = @transform_2, window_bounds = array<i64: 16, 256>}, {pipeline_mode = #tpu.pipeline_mode<synchronous>, transform_indices = @transform_3, window_bounds = array<i64: 1, 256>}, {pipeline_mode = #tpu.pipeline_mode<synchronous>, transform_indices = @transform_4, window_bounds = array<i64: 128, 256>}, {pipeline_mode = #tpu.pipeline_mode<synchronous>, transform_indices = @transform_5, window_bounds = array<i64: 1, 256>}, {transform_indices = @transform_6, window_bounds = array<i64: 8, 8, 128>}]} {
    %c0_i32 = arith.constant 0 : i32
    %0 = arith.cmpi eq, %arg1, %c0_i32 : i32
    %1 = arith.extui %0 : i1 to i32
    %c0_i32_0 = arith.constant 0 : i32
    %2 = arith.cmpi ne, %1, %c0_i32_0 : i32
    scf.if %2 {
      %cst = arith.constant 0.000000e+00 : f32
      %9 = vector.broadcast %cst : f32 to vector<8x128xf32>
      %c0 = arith.constant 0 : index
      %c0_3 = arith.constant 0 : index
      %10 = vector.load %arg11[%c0, %c0_3] : memref<8x128xf32, #tpu.memory_space<vmem>>, vector<8x128xf32>
      tpu.vector_store %arg11[%c0, %c0_3], %9 {strides = array<i32>} : memref<8x128xf32, #tpu.memory_space<vmem>>, vector<8x128xf32>,
    } else {
    }
    %3 = arith.index_cast %arg0 : i32 to index
    %4 = arith.index_cast %arg1 : i32 to index
    %5 = memref.load %arg2[%3, %4] : memref<1x1xi32, #tpu.memory_space<smem>>
    %c0_i32_1 = arith.constant 0 : i32
    %6 = arith.cmpi sgt, %5, %c0_i32_1 : i32
    %7 = arith.extui %6 : i1 to i32
    %c0_i32_2 = arith.constant 0 : i32
    %8 = arith.cmpi ne, %7, %c0_i32_2 : i32
    scf.if %8 {
      %c0 = arith.constant 0 : index
      %c0_3 = arith.constant 0 : index
      %9 = vector.load %arg5[%c0, %c0_3] : memref<16x256xf32, #tpu.memory_space<vmem>>, vector<16x256xf32>
      %c0_4 = arith.constant 0 : index
      %c0_5 = arith.constant 0 : index
      %10 = vector.load %arg7[%c0_4, %c0_5] : memref<128x256xf32, #tpu.memory_space<vmem>>, vector<128x256xf32>
      %c0_6 = arith.constant 0 : index
      %c0_7 = arith.constant 0 : index
      %11 = vector.load %arg6[%c0_6, %c0_7] : memref<1x256xf32, #tpu.memory_space<vmem>>, vector<1x256xf32>
      %c0_8 = arith.constant 0 : index
      %c0_9 = arith.constant 0 : index
      %12 = vector.load %arg8[%c0_8, %c0_9] : memref<1x256xf32, #tpu.memory_space<vmem>>, vector<1x256xf32>
      %c0_10 = arith.constant 0 : index
      %c0_11 = arith.constant 0 : index
      %c0_12 = arith.constant 0 : index
      %13 = vector.load %arg3[%c0_10, %c0_11, %c0_12] : memref<8x8x16xf32, #tpu.memory_space<vmem>>, vector<8x8x16xf32>
      %14 = vector.shape_cast %13 : vector<8x8x16xf32> to vector<64x16xf32>
      %cst = arith.constant dense<0.000000e+00> : vector<64x256xf32>
      %15 = tpu.matmul %14, %9, %cst {dimension_numbers = #tpu.dot_dimension_numbers<[1], [0], [0], [1], [0, 0, 1, 1], [], []>} : vector<64x16xf32>, vector<16x256xf32>, vector<64x256xf32> -> vector<64x256xf32>
      %16 = vector.shape_cast %15 : vector<64x256xf32> to vector<8x8x256xf32>
      %17 = vector.shape_cast %11 : vector<1x256xf32> to vector<1x1x256xf32>
      %18 = vector.broadcast %17 : vector<1x1x256xf32> to vector<8x8x256xf32>
      %19 = arith.addf %16, %18 : vector<8x8x256xf32>
      %c0_13 = arith.constant 0 : index
      %c0_14 = arith.constant 0 : index
      %c0_15 = arith.constant 0 : index
      %20 = vector.load %arg10[%c0_13, %c0_14, %c0_15] : memref<8x8x256xf32, #tpu.memory_space<vmem>>, vector<8x8x256xf32>
      tpu.vector_store %arg10[%c0_13, %c0_14, %c0_15], %19 {strides = array<i32>} : memref<8x8x256xf32, #tpu.memory_space<vmem>>, vector<8x8x256xf32>,
      %c0_16 = arith.constant 0 : index
      %c0_17 = arith.constant 0 : index
      %21 = vector.load %arg11[%c0_16, %c0_17] : memref<8x128xf32, #tpu.memory_space<vmem>>, vector<8x128xf32>
      %c0_i32_18 = arith.constant 0 : i32
      %22 = arith.index_cast %c0_i32_18 : i32 to index
      %c0_19 = arith.constant 0 : index
      %c0_20 = arith.constant 0 : index
      %23 = vector.load %arg10[%22, %c0_19, %c0_20] : memref<8x8x256xf32, #tpu.memory_space<vmem>>, vector<1x8x256xf32>
      %24 = vector.shape_cast %23 : vector<1x8x256xf32> to vector<8x256xf32>
      %25 = arith.index_cast %c0_i32_18 : i32 to index
      %c0_21 = arith.constant 0 : index
      %c0_22 = arith.constant 0 : index
      %26 = vector.load %arg4[%25, %c0_21, %c0_22] : memref<8x8x1xf32, #tpu.memory_space<vmem>>, vector<1x8x1xf32>
      %27 = vector.shape_cast %26 : vector<1x8x1xf32> to vector<8x1xf32>
      %cst_23 = arith.constant dense<0.000000e+00> : vector<8x256xf32>
      %28 = tpu.matmul %21, %10, %cst_23 {dimension_numbers = #tpu.dot_dimension_numbers<[1], [0], [0], [1], [0, 0, 1, 1], [], []>} : vector<8x128xf32>, vector<128x256xf32>, vector<8x256xf32> -> vector<8x256xf32>
      %29 = vector.broadcast %12 : vector<1x256xf32> to vector<8x256xf32>
      %30 = arith.addf %28, %29 : vector<8x256xf32>
      %31 = vector.extract_strided_slice %24 {offsets = [0, 0], sizes = [8, 128], strides = [1, 1]} : vector<8x256xf32> to vector<8x128xf32>
      %32 = vector.extract_strided_slice %30 {offsets = [0, 0], sizes = [8, 128], strides = [1, 1]} : vector<8x256xf32> to vector<8x128xf32>
      %33 = vector.extract_strided_slice %24 {offsets = [0, 128], sizes = [8, 128], strides = [1, 1]} : vector<8x256xf32> to vector<8x128xf32>
      %34 = vector.extract_strided_slice %30 {offsets = [0, 128], sizes = [8, 128], strides = [1, 1]} : vector<8x256xf32> to vector<8x128xf32>
      %35 = arith.addf %31, %32 : vector<8x128xf32>
      %36 = arith.negf %35 : vector<8x128xf32>
      %37 = math.exp %36 : vector<8x128xf32>
      %cst_24 = arith.constant 1.000000e+00 : f32
      %38 = vector.broadcast %cst_24 : f32 to vector<8x128xf32>
      %39 = arith.addf %38, %37 : vector<8x128xf32>
      %40 = arith.divf %38, %39 : vector<8x128xf32>
      %41 = arith.mulf %40, %34 : vector<8x128xf32>
      %42 = arith.addf %33, %41 : vector<8x128xf32>
      %43 = math.tanh %42 : vector<8x128xf32>
      %44 = arith.subf %43, %21 : vector<8x128xf32>
      %45 = vector.broadcast %27 : vector<8x1xf32> to vector<8x128xf32>
      %46 = arith.mulf %45, %44 : vector<8x128xf32>
      %47 = arith.addf %21, %46 : vector<8x128xf32>
      %48 = arith.index_cast %c0_i32_18 : i32 to index
      %c0_25 = arith.constant 0 : index
      %c0_26 = arith.constant 0 : index
      %49 = vector.load %arg9[%48, %c0_25, %c0_26] : memref<8x8x128xf32, #tpu.memory_space<vmem>>, vector<1x8x128xf32>
      %50 = vector.shape_cast %49 : vector<1x8x128xf32> to vector<8x128xf32>
      %51 = vector.shape_cast %47 : vector<8x128xf32> to vector<1x8x128xf32>
      tpu.vector_store %arg9[%48, %c0_25, %c0_26], %51 {strides = array<i32>} : memref<8x8x128xf32, #tpu.memory_space<vmem>>, vector<1x8x128xf32>,
      %c1_i32 = arith.constant 1 : i32
      %52 = arith.index_cast %c1_i32 : i32 to index
      %c0_27 = arith.constant 0 : index
      %c0_28 = arith.constant 0 : index
      %53 = vector.load %arg10[%52, %c0_27, %c0_28] : memref<8x8x256xf32, #tpu.memory_space<vmem>>, vector<1x8x256xf32>
      %54 = vector.shape_cast %53 : vector<1x8x256xf32> to vector<8x256xf32>
      %55 = arith.index_cast %c1_i32 : i32 to index
      %c0_29 = arith.constant 0 : index
      %c0_30 = arith.constant 0 : index
      %56 = vector.load %arg4[%55, %c0_29, %c0_30] : memref<8x8x1xf32, #tpu.memory_space<vmem>>, vector<1x8x1xf32>
      %57 = vector.shape_cast %56 : vector<1x8x1xf32> to vector<8x1xf32>
      %cst_31 = arith.constant dense<0.000000e+00> : vector<8x256xf32>
      %58 = tpu.matmul %47, %10, %cst_31 {dimension_numbers = #tpu.dot_dimension_numbers<[1], [0], [0], [1], [0, 0, 1, 1], [], []>} : vector<8x128xf32>, vector<128x256xf32>, vector<8x256xf32> -> vector<8x256xf32>
      %59 = vector.broadcast %12 : vector<1x256xf32> to vector<8x256xf32>
      %60 = arith.addf %58, %59 : vector<8x256xf32>
      %61 = vector.extract_strided_slice %54 {offsets = [0, 0], sizes = [8, 128], strides = [1, 1]} : vector<8x256xf32> to vector<8x128xf32>
      %62 = vector.extract_strided_slice %60 {offsets = [0, 0], sizes = [8, 128], strides = [1, 1]} : vector<8x256xf32> to vector<8x128xf32>
      %63 = vector.extract_strided_slice %54 {offsets = [0, 128], sizes = [8, 128], strides = [1, 1]} : vector<8x256xf32> to vector<8x128xf32>
      %64 = vector.extract_strided_slice %60 {offsets = [0, 128], sizes = [8, 128], strides = [1, 1]} : vector<8x256xf32> to vector<8x128xf32>
      %65 = arith.addf %61, %62 : vector<8x128xf32>
      %66 = arith.negf %65 : vector<8x128xf32>
      %67 = math.exp %66 : vector<8x128xf32>
      %cst_32 = arith.constant 1.000000e+00 : f32
      %68 = vector.broadcast %cst_32 : f32 to vector<8x128xf32>
      %69 = arith.addf %68, %67 : vector<8x128xf32>
      %70 = arith.divf %68, %69 : vector<8x128xf32>
      %71 = arith.mulf %70, %64 : vector<8x128xf32>
      %72 = arith.addf %63, %71 : vector<8x128xf32>
      %73 = math.tanh %72 : vector<8x128xf32>
      %74 = arith.subf %73, %47 : vector<8x128xf32>
      %75 = vector.broadcast %57 : vector<8x1xf32> to vector<8x128xf32>
      %76 = arith.mulf %75, %74 : vector<8x128xf32>
      %77 = arith.addf %47, %76 : vector<8x128xf32>
      %78 = arith.index_cast %c1_i32 : i32 to index
      %c0_33 = arith.constant 0 : index
      %c0_34 = arith.constant 0 : index
      %79 = vector.load %arg9[%78, %c0_33, %c0_34] : memref<8x8x128xf32, #tpu.memory_space<vmem>>, vector<1x8x128xf32>
      %80 = vector.shape_cast %79 : vector<1x8x128xf32> to vector<8x128xf32>
      %81 = vector.shape_cast %77 : vector<8x128xf32> to vector<1x8x128xf32>
      tpu.vector_store %arg9[%78, %c0_33, %c0_34], %81 {strides = array<i32>} : memref<8x8x128xf32, #tpu.memory_space<vmem>>, vector<1x8x128xf32>,
      %c2_i32 = arith.constant 2 : i32
      %82 = arith.index_cast %c2_i32 : i32 to index
      %c0_35 = arith.constant 0 : index
      %c0_36 = arith.constant 0 : index
      %83 = vector.load %arg10[%82, %c0_35, %c0_36] : memref<8x8x256xf32, #tpu.memory_space<vmem>>, vector<1x8x256xf32>
      %84 = vector.shape_cast %83 : vector<1x8x256xf32> to vector<8x256xf32>
      %85 = arith.index_cast %c2_i32 : i32 to index
      %c0_37 = arith.constant 0 : index
      %c0_38 = arith.constant 0 : index
      %86 = vector.load %arg4[%85, %c0_37, %c0_38] : memref<8x8x1xf32, #tpu.memory_space<vmem>>, vector<1x8x1xf32>
      %87 = vector.shape_cast %86 : vector<1x8x1xf32> to vector<8x1xf32>
      %cst_39 = arith.constant dense<0.000000e+00> : vector<8x256xf32>
      %88 = tpu.matmul %77, %10, %cst_39 {dimension_numbers = #tpu.dot_dimension_numbers<[1], [0], [0], [1], [0, 0, 1, 1], [], []>} : vector<8x128xf32>, vector<128x256xf32>, vector<8x256xf32> -> vector<8x256xf32>
      %89 = vector.broadcast %12 : vector<1x256xf32> to vector<8x256xf32>
      %90 = arith.addf %88, %89 : vector<8x256xf32>
      %91 = vector.extract_strided_slice %84 {offsets = [0, 0], sizes = [8, 128], strides = [1, 1]} : vector<8x256xf32> to vector<8x128xf32>
      %92 = vector.extract_strided_slice %90 {offsets = [0, 0], sizes = [8, 128], strides = [1, 1]} : vector<8x256xf32> to vector<8x128xf32>
      %93 = vector.extract_strided_slice %84 {offsets = [0, 128], sizes = [8, 128], strides = [1, 1]} : vector<8x256xf32> to vector<8x128xf32>
      %94 = vector.extract_strided_slice %90 {offsets = [0, 128], sizes = [8, 128], strides = [1, 1]} : vector<8x256xf32> to vector<8x128xf32>
      %95 = arith.addf %91, %92 : vector<8x128xf32>
      %96 = arith.negf %95 : vector<8x128xf32>
      %97 = math.exp %96 : vector<8x128xf32>
      %cst_40 = arith.constant 1.000000e+00 : f32
      %98 = vector.broadcast %cst_40 : f32 to vector<8x128xf32>
      %99 = arith.addf %98, %97 : vector<8x128xf32>
      %100 = arith.divf %98, %99 : vector<8x128xf32>
      %101 = arith.mulf %100, %94 : vector<8x128xf32>
      %102 = arith.addf %93, %101 : vector<8x128xf32>
      %103 = math.tanh %102 : vector<8x128xf32>
      %104 = arith.subf %103, %77 : vector<8x128xf32>
      %105 = vector.broadcast %87 : vector<8x1xf32> to vector<8x128xf32>
      %106 = arith.mulf %105, %104 : vector<8x128xf32>
      %107 = arith.addf %77, %106 : vector<8x128xf32>
      %108 = arith.index_cast %c2_i32 : i32 to index
      %c0_41 = arith.constant 0 : index
      %c0_42 = arith.constant 0 : index
      %109 = vector.load %arg9[%108, %c0_41, %c0_42] : memref<8x8x128xf32, #tpu.memory_space<vmem>>, vector<1x8x128xf32>
      %110 = vector.shape_cast %109 : vector<1x8x128xf32> to vector<8x128xf32>
      %111 = vector.shape_cast %107 : vector<8x128xf32> to vector<1x8x128xf32>
      tpu.vector_store %arg9[%108, %c0_41, %c0_42], %111 {strides = array<i32>} : memref<8x8x128xf32, #tpu.memory_space<vmem>>, vector<1x8x128xf32>,
      %c3_i32 = arith.constant 3 : i32
      %112 = arith.index_cast %c3_i32 : i32 to index
      %c0_43 = arith.constant 0 : index
      %c0_44 = arith.constant 0 : index
      %113 = vector.load %arg10[%112, %c0_43, %c0_44] : memref<8x8x256xf32, #tpu.memory_space<vmem>>, vector<1x8x256xf32>
      %114 = vector.shape_cast %113 : vector<1x8x256xf32> to vector<8x256xf32>
      %115 = arith.index_cast %c3_i32 : i32 to index
      %c0_45 = arith.constant 0 : index
      %c0_46 = arith.constant 0 : index
      %116 = vector.load %arg4[%115, %c0_45, %c0_46] : memref<8x8x1xf32, #tpu.memory_space<vmem>>, vector<1x8x1xf32>
      %117 = vector.shape_cast %116 : vector<1x8x1xf32> to vector<8x1xf32>
      %cst_47 = arith.constant dense<0.000000e+00> : vector<8x256xf32>
      %118 = tpu.matmul %107, %10, %cst_47 {dimension_numbers = #tpu.dot_dimension_numbers<[1], [0], [0], [1], [0, 0, 1, 1], [], []>} : vector<8x128xf32>, vector<128x256xf32>, vector<8x256xf32> -> vector<8x256xf32>
      %119 = vector.broadcast %12 : vector<1x256xf32> to vector<8x256xf32>
      %120 = arith.addf %118, %119 : vector<8x256xf32>
      %121 = vector.extract_strided_slice %114 {offsets = [0, 0], sizes = [8, 128], strides = [1, 1]} : vector<8x256xf32> to vector<8x128xf32>
      %122 = vector.extract_strided_slice %120 {offsets = [0, 0], sizes = [8, 128], strides = [1, 1]} : vector<8x256xf32> to vector<8x128xf32>
      %123 = vector.extract_strided_slice %114 {offsets = [0, 128], sizes = [8, 128], strides = [1, 1]} : vector<8x256xf32> to vector<8x128xf32>
      %124 = vector.extract_strided_slice %120 {offsets = [0, 128], sizes = [8, 128], strides = [1, 1]} : vector<8x256xf32> to vector<8x128xf32>
      %125 = arith.addf %121, %122 : vector<8x128xf32>
      %126 = arith.negf %125 : vector<8x128xf32>
      %127 = math.exp %126 : vector<8x128xf32>
      %cst_48 = arith.constant 1.000000e+00 : f32
      %128 = vector.broadcast %cst_48 : f32 to vector<8x128xf32>
      %129 = arith.addf %128, %127 : vector<8x128xf32>
      %130 = arith.divf %128, %129 : vector<8x128xf32>
      %131 = arith.mulf %130, %124 : vector<8x128xf32>
      %132 = arith.addf %123, %131 : vector<8x128xf32>
      %133 = math.tanh %132 : vector<8x128xf32>
      %134 = arith.subf %133, %107 : vector<8x128xf32>
      %135 = vector.broadcast %117 : vector<8x1xf32> to vector<8x128xf32>
      %136 = arith.mulf %135, %134 : vector<8x128xf32>
      %137 = arith.addf %107, %136 : vector<8x128xf32>
      %138 = arith.index_cast %c3_i32 : i32 to index
      %c0_49 = arith.constant 0 : index
      %c0_50 = arith.constant 0 : index
      %139 = vector.load %arg9[%138, %c0_49, %c0_50] : memref<8x8x128xf32, #tpu.memory_space<vmem>>, vector<1x8x128xf32>
      %140 = vector.shape_cast %139 : vector<1x8x128xf32> to vector<8x128xf32>
      %141 = vector.shape_cast %137 : vector<8x128xf32> to vector<1x8x128xf32>
      tpu.vector_store %arg9[%138, %c0_49, %c0_50], %141 {strides = array<i32>} : memref<8x8x128xf32, #tpu.memory_space<vmem>>, vector<1x8x128xf32>,
      %c4_i32 = arith.constant 4 : i32
      %142 = arith.index_cast %c4_i32 : i32 to index
      %c0_51 = arith.constant 0 : index
      %c0_52 = arith.constant 0 : index
      %143 = vector.load %arg10[%142, %c0_51, %c0_52] : memref<8x8x256xf32, #tpu.memory_space<vmem>>, vector<1x8x256xf32>
      %144 = vector.shape_cast %143 : vector<1x8x256xf32> to vector<8x256xf32>
      %145 = arith.index_cast %c4_i32 : i32 to index
      %c0_53 = arith.constant 0 : index
      %c0_54 = arith.constant 0 : index
      %146 = vector.load %arg4[%145, %c0_53, %c0_54] : memref<8x8x1xf32, #tpu.memory_space<vmem>>, vector<1x8x1xf32>
      %147 = vector.shape_cast %146 : vector<1x8x1xf32> to vector<8x1xf32>
      %cst_55 = arith.constant dense<0.000000e+00> : vector<8x256xf32>
      %148 = tpu.matmul %137, %10, %cst_55 {dimension_numbers = #tpu.dot_dimension_numbers<[1], [0], [0], [1], [0, 0, 1, 1], [], []>} : vector<8x128xf32>, vector<128x256xf32>, vector<8x256xf32> -> vector<8x256xf32>
      %149 = vector.broadcast %12 : vector<1x256xf32> to vector<8x256xf32>
      %150 = arith.addf %148, %149 : vector<8x256xf32>
      %151 = vector.extract_strided_slice %144 {offsets = [0, 0], sizes = [8, 128], strides = [1, 1]} : vector<8x256xf32> to vector<8x128xf32>
      %152 = vector.extract_strided_slice %150 {offsets = [0, 0], sizes = [8, 128], strides = [1, 1]} : vector<8x256xf32> to vector<8x128xf32>
      %153 = vector.extract_strided_slice %144 {offsets = [0, 128], sizes = [8, 128], strides = [1, 1]} : vector<8x256xf32> to vector<8x128xf32>
      %154 = vector.extract_strided_slice %150 {offsets = [0, 128], sizes = [8, 128], strides = [1, 1]} : vector<8x256xf32> to vector<8x128xf32>
      %155 = arith.addf %151, %152 : vector<8x128xf32>
      %156 = arith.negf %155 : vector<8x128xf32>
      %157 = math.exp %156 : vector<8x128xf32>
      %cst_56 = arith.constant 1.000000e+00 : f32
      %158 = vector.broadcast %cst_56 : f32 to vector<8x128xf32>
      %159 = arith.addf %158, %157 : vector<8x128xf32>
      %160 = arith.divf %158, %159 : vector<8x128xf32>
      %161 = arith.mulf %160, %154 : vector<8x128xf32>
      %162 = arith.addf %153, %161 : vector<8x128xf32>
      %163 = math.tanh %162 : vector<8x128xf32>
      %164 = arith.subf %163, %137 : vector<8x128xf32>
      %165 = vector.broadcast %147 : vector<8x1xf32> to vector<8x128xf32>
      %166 = arith.mulf %165, %164 : vector<8x128xf32>
      %167 = arith.addf %137, %166 : vector<8x128xf32>
      %168 = arith.index_cast %c4_i32 : i32 to index
      %c0_57 = arith.constant 0 : index
      %c0_58 = arith.constant 0 : index
      %169 = vector.load %arg9[%168, %c0_57, %c0_58] : memref<8x8x128xf32, #tpu.memory_space<vmem>>, vector<1x8x128xf32>
      %170 = vector.shape_cast %169 : vector<1x8x128xf32> to vector<8x128xf32>
      %171 = vector.shape_cast %167 : vector<8x128xf32> to vector<1x8x128xf32>
      tpu.vector_store %arg9[%168, %c0_57, %c0_58], %171 {strides = array<i32>} : memref<8x8x128xf32, #tpu.memory_space<vmem>>, vector<1x8x128xf32>,
      %c5_i32 = arith.constant 5 : i32
      %172 = arith.index_cast %c5_i32 : i32 to index
      %c0_59 = arith.constant 0 : index
      %c0_60 = arith.constant 0 : index
      %173 = vector.load %arg10[%172, %c0_59, %c0_60] : memref<8x8x256xf32, #tpu.memory_space<vmem>>, vector<1x8x256xf32>
      %174 = vector.shape_cast %173 : vector<1x8x256xf32> to vector<8x256xf32>
      %175 = arith.index_cast %c5_i32 : i32 to index
      %c0_61 = arith.constant 0 : index
      %c0_62 = arith.constant 0 : index
      %176 = vector.load %arg4[%175, %c0_61, %c0_62] : memref<8x8x1xf32, #tpu.memory_space<vmem>>, vector<1x8x1xf32>
      %177 = vector.shape_cast %176 : vector<1x8x1xf32> to vector<8x1xf32>
      %cst_63 = arith.constant dense<0.000000e+00> : vector<8x256xf32>
      %178 = tpu.matmul %167, %10, %cst_63 {dimension_numbers = #tpu.dot_dimension_numbers<[1], [0], [0], [1], [0, 0, 1, 1], [], []>} : vector<8x128xf32>, vector<128x256xf32>, vector<8x256xf32> -> vector<8x256xf32>
      %179 = vector.broadcast %12 : vector<1x256xf32> to vector<8x256xf32>
      %180 = arith.addf %178, %179 : vector<8x256xf32>
      %181 = vector.extract_strided_slice %174 {offsets = [0, 0], sizes = [8, 128], strides = [1, 1]} : vector<8x256xf32> to vector<8x128xf32>
      %182 = vector.extract_strided_slice %180 {offsets = [0, 0], sizes = [8, 128], strides = [1, 1]} : vector<8x256xf32> to vector<8x128xf32>
      %183 = vector.extract_strided_slice %174 {offsets = [0, 128], sizes = [8, 128], strides = [1, 1]} : vector<8x256xf32> to vector<8x128xf32>
      %184 = vector.extract_strided_slice %180 {offsets = [0, 128], sizes = [8, 128], strides = [1, 1]} : vector<8x256xf32> to vector<8x128xf32>
      %185 = arith.addf %181, %182 : vector<8x128xf32>
      %186 = arith.negf %185 : vector<8x128xf32>
      %187 = math.exp %186 : vector<8x128xf32>
      %cst_64 = arith.constant 1.000000e+00 : f32
      %188 = vector.broadcast %cst_64 : f32 to vector<8x128xf32>
      %189 = arith.addf %188, %187 : vector<8x128xf32>
      %190 = arith.divf %188, %189 : vector<8x128xf32>
      %191 = arith.mulf %190, %184 : vector<8x128xf32>
      %192 = arith.addf %183, %191 : vector<8x128xf32>
      %193 = math.tanh %192 : vector<8x128xf32>
      %194 = arith.subf %193, %167 : vector<8x128xf32>
      %195 = vector.broadcast %177 : vector<8x1xf32> to vector<8x128xf32>
      %196 = arith.mulf %195, %194 : vector<8x128xf32>
      %197 = arith.addf %167, %196 : vector<8x128xf32>
      %198 = arith.index_cast %c5_i32 : i32 to index
      %c0_65 = arith.constant 0 : index
      %c0_66 = arith.constant 0 : index
      %199 = vector.load %arg9[%198, %c0_65, %c0_66] : memref<8x8x128xf32, #tpu.memory_space<vmem>>, vector<1x8x128xf32>
      %200 = vector.shape_cast %199 : vector<1x8x128xf32> to vector<8x128xf32>
      %201 = vector.shape_cast %197 : vector<8x128xf32> to vector<1x8x128xf32>
      tpu.vector_store %arg9[%198, %c0_65, %c0_66], %201 {strides = array<i32>} : memref<8x8x128xf32, #tpu.memory_space<vmem>>, vector<1x8x128xf32>,
      %c6_i32 = arith.constant 6 : i32
      %202 = arith.index_cast %c6_i32 : i32 to index
      %c0_67 = arith.constant 0 : index
      %c0_68 = arith.constant 0 : index
      %203 = vector.load %arg10[%202, %c0_67, %c0_68] : memref<8x8x256xf32, #tpu.memory_space<vmem>>, vector<1x8x256xf32>
      %204 = vector.shape_cast %203 : vector<1x8x256xf32> to vector<8x256xf32>
      %205 = arith.index_cast %c6_i32 : i32 to index
      %c0_69 = arith.constant 0 : index
      %c0_70 = arith.constant 0 : index
      %206 = vector.load %arg4[%205, %c0_69, %c0_70] : memref<8x8x1xf32, #tpu.memory_space<vmem>>, vector<1x8x1xf32>
      %207 = vector.shape_cast %206 : vector<1x8x1xf32> to vector<8x1xf32>
      %cst_71 = arith.constant dense<0.000000e+00> : vector<8x256xf32>
      %208 = tpu.matmul %197, %10, %cst_71 {dimension_numbers = #tpu.dot_dimension_numbers<[1], [0], [0], [1], [0, 0, 1, 1], [], []>} : vector<8x128xf32>, vector<128x256xf32>, vector<8x256xf32> -> vector<8x256xf32>
      %209 = vector.broadcast %12 : vector<1x256xf32> to vector<8x256xf32>
      %210 = arith.addf %208, %209 : vector<8x256xf32>
      %211 = vector.extract_strided_slice %204 {offsets = [0, 0], sizes = [8, 128], strides = [1, 1]} : vector<8x256xf32> to vector<8x128xf32>
      %212 = vector.extract_strided_slice %210 {offsets = [0, 0], sizes = [8, 128], strides = [1, 1]} : vector<8x256xf32> to vector<8x128xf32>
      %213 = vector.extract_strided_slice %204 {offsets = [0, 128], sizes = [8, 128], strides = [1, 1]} : vector<8x256xf32> to vector<8x128xf32>
      %214 = vector.extract_strided_slice %210 {offsets = [0, 128], sizes = [8, 128], strides = [1, 1]} : vector<8x256xf32> to vector<8x128xf32>
      %215 = arith.addf %211, %212 : vector<8x128xf32>
      %216 = arith.negf %215 : vector<8x128xf32>
      %217 = math.exp %216 : vector<8x128xf32>
      %cst_72 = arith.constant 1.000000e+00 : f32
      %218 = vector.broadcast %cst_72 : f32 to vector<8x128xf32>
      %219 = arith.addf %218, %217 : vector<8x128xf32>
      %220 = arith.divf %218, %219 : vector<8x128xf32>
      %221 = arith.mulf %220, %214 : vector<8x128xf32>
      %222 = arith.addf %213, %221 : vector<8x128xf32>
      %223 = math.tanh %222 : vector<8x128xf32>
      %224 = arith.subf %223, %197 : vector<8x128xf32>
      %225 = vector.broadcast %207 : vector<8x1xf32> to vector<8x128xf32>
      %226 = arith.mulf %225, %224 : vector<8x128xf32>
      %227 = arith.addf %197, %226 : vector<8x128xf32>
      %228 = arith.index_cast %c6_i32 : i32 to index
      %c0_73 = arith.constant 0 : index
      %c0_74 = arith.constant 0 : index
      %229 = vector.load %arg9[%228, %c0_73, %c0_74] : memref<8x8x128xf32, #tpu.memory_space<vmem>>, vector<1x8x128xf32>
      %230 = vector.shape_cast %229 : vector<1x8x128xf32> to vector<8x128xf32>
      %231 = vector.shape_cast %227 : vector<8x128xf32> to vector<1x8x128xf32>
      tpu.vector_store %arg9[%228, %c0_73, %c0_74], %231 {strides = array<i32>} : memref<8x8x128xf32, #tpu.memory_space<vmem>>, vector<1x8x128xf32>,
      %c7_i32 = arith.constant 7 : i32
      %232 = arith.index_cast %c7_i32 : i32 to index
      %c0_75 = arith.constant 0 : index
      %c0_76 = arith.constant 0 : index
      %233 = vector.load %arg10[%232, %c0_75, %c0_76] : memref<8x8x256xf32, #tpu.memory_space<vmem>>, vector<1x8x256xf32>
      %234 = vector.shape_cast %233 : vector<1x8x256xf32> to vector<8x256xf32>
      %235 = arith.index_cast %c7_i32 : i32 to index
      %c0_77 = arith.constant 0 : index
      %c0_78 = arith.constant 0 : index
      %236 = vector.load %arg4[%235, %c0_77, %c0_78] : memref<8x8x1xf32, #tpu.memory_space<vmem>>, vector<1x8x1xf32>
      %237 = vector.shape_cast %236 : vector<1x8x1xf32> to vector<8x1xf32>
      %cst_79 = arith.constant dense<0.000000e+00> : vector<8x256xf32>
      %238 = tpu.matmul %227, %10, %cst_79 {dimension_numbers = #tpu.dot_dimension_numbers<[1], [0], [0], [1], [0, 0, 1, 1], [], []>} : vector<8x128xf32>, vector<128x256xf32>, vector<8x256xf32> -> vector<8x256xf32>
      %239 = vector.broadcast %12 : vector<1x256xf32> to vector<8x256xf32>
      %240 = arith.addf %238, %239 : vector<8x256xf32>
      %241 = vector.extract_strided_slice %234 {offsets = [0, 0], sizes = [8, 128], strides = [1, 1]} : vector<8x256xf32> to vector<8x128xf32>
      %242 = vector.extract_strided_slice %240 {offsets = [0, 0], sizes = [8, 128], strides = [1, 1]} : vector<8x256xf32> to vector<8x128xf32>
      %243 = vector.extract_strided_slice %234 {offsets = [0, 128], sizes = [8, 128], strides = [1, 1]} : vector<8x256xf32> to vector<8x128xf32>
      %244 = vector.extract_strided_slice %240 {offsets = [0, 128], sizes = [8, 128], strides = [1, 1]} : vector<8x256xf32> to vector<8x128xf32>
      %245 = arith.addf %241, %242 : vector<8x128xf32>
      %246 = arith.negf %245 : vector<8x128xf32>
      %247 = math.exp %246 : vector<8x128xf32>
      %cst_80 = arith.constant 1.000000e+00 : f32
      %248 = vector.broadcast %cst_80 : f32 to vector<8x128xf32>
      %249 = arith.addf %248, %247 : vector<8x128xf32>
      %250 = arith.divf %248, %249 : vector<8x128xf32>
      %251 = arith.mulf %250, %244 : vector<8x128xf32>
      %252 = arith.addf %243, %251 : vector<8x128xf32>
      %253 = math.tanh %252 : vector<8x128xf32>
      %254 = arith.subf %253, %227 : vector<8x128xf32>
      %255 = vector.broadcast %237 : vector<8x1xf32> to vector<8x128xf32>
      %256 = arith.mulf %255, %254 : vector<8x128xf32>
      %257 = arith.addf %227, %256 : vector<8x128xf32>
      %258 = arith.index_cast %c7_i32 : i32 to index
      %c0_81 = arith.constant 0 : index
      %c0_82 = arith.constant 0 : index
      %259 = vector.load %arg9[%258, %c0_81, %c0_82] : memref<8x8x128xf32, #tpu.memory_space<vmem>>, vector<1x8x128xf32>
      %260 = vector.shape_cast %259 : vector<1x8x128xf32> to vector<8x128xf32>
      %261 = vector.shape_cast %257 : vector<8x128xf32> to vector<1x8x128xf32>
      tpu.vector_store %arg9[%258, %c0_81, %c0_82], %261 {strides = array<i32>} : memref<8x8x128xf32, #tpu.memory_space<vmem>>, vector<1x8x128xf32>,
      %c8_i32 = arith.constant 8 : i32
      %c0_83 = arith.constant 0 : index
      %c0_84 = arith.constant 0 : index
      %262 = vector.load %arg11[%c0_83, %c0_84] : memref<8x128xf32, #tpu.memory_space<vmem>>, vector<8x128xf32>
      tpu.vector_store %arg11[%c0_83, %c0_84], %257 {strides = array<i32>} : memref<8x128xf32, #tpu.memory_space<vmem>>, vector<8x128xf32>,
    } else {
    }
    return
  }
  func.func @transform_0(%arg0: i32, %arg1: i32, %arg2: memref<1x1xi32, #tpu.memory_space<smem>>) -> (i32, i32, i32) {
    %c0_i32 = arith.constant 0 : i32
    %c0_i32_0 = arith.constant 0 : i32
    return %arg1, %arg0, %c0_i32 : i32, i32, i32
  }
  func.func @transform_1(%arg0: i32, %arg1: i32, %arg2: memref<1x1xi32, #tpu.memory_space<smem>>) -> (i32, i32, i32) {
    %c0_i32 = arith.constant 0 : i32
    %c0_i32_0 = arith.constant 0 : i32
    return %arg1, %arg0, %c0_i32 : i32, i32, i32
  }
  func.func @transform_2(%arg0: i32, %arg1: i32, %arg2: memref<1x1xi32, #tpu.memory_space<smem>>) -> (i32, i32) {
    %c0_i32 = arith.constant 0 : i32
    %c0_i32_0 = arith.constant 0 : i32
    %c0_i32_1 = arith.constant 0 : i32
    return %c0_i32, %c0_i32_0 : i32, i32
  }
  func.func @transform_3(%arg0: i32, %arg1: i32, %arg2: memref<1x1xi32, #tpu.memory_space<smem>>) -> (i32, i32) {
    %c0_i32 = arith.constant 0 : i32
    %c0_i32_0 = arith.constant 0 : i32
    %c0_i32_1 = arith.constant 0 : i32
    return %c0_i32, %c0_i32_0 : i32, i32
  }
  func.func @transform_4(%arg0: i32, %arg1: i32, %arg2: memref<1x1xi32, #tpu.memory_space<smem>>) -> (i32, i32) {
    %c0_i32 = arith.constant 0 : i32
    %c0_i32_0 = arith.constant 0 : i32
    %c0_i32_1 = arith.constant 0 : i32
    return %c0_i32, %c0_i32_0 : i32, i32
  }
  func.func @transform_5(%arg0: i32, %arg1: i32, %arg2: memref<1x1xi32, #tpu.memory_space<smem>>) -> (i32, i32) {
    %c0_i32 = arith.constant 0 : i32
    %c0_i32_0 = arith.constant 0 : i32
    %c0_i32_1 = arith.constant 0 : i32
    return %c0_i32, %c0_i32_0 : i32, i32
  }
  func.func @transform_6(%arg0: i32, %arg1: i32, %arg2: memref<1x1xi32, #tpu.memory_space<smem>>) -> (i32, i32, i32) {
    %c0_i32 = arith.constant 0 : i32
    %c0_i32_0 = arith.constant 0 : i32
    return %arg1, %arg0, %c0_i32 : i32, i32, i32
  }
}

</mosaic_0001>

<bundles_post_ra>
// kernel: _dynamic_gru_impl.1
= control target key start
LH: loop header
LB: loop body
LE: loop exit
PB: predicated region body
PF: predicated region fallthrough
CT: control target
= control target key end

     0   :  { %v952_v0 = vmov 0.0   ;;  %s1616_s0 = inlined_call_operand.<no memory space> [shape: s32[1,1], index: 0, kind: input, shape index: {}]   ;;  %s1617_s1 = inlined_call_operand.vmem [shape: f32[8,8,16], index: 1, kind: input, shape index: {}]   ;;  %s1618_s2 = inlined_call_operand.vmem [shape: f32[8,8,1], index: 2, kind: input, shape index: {}]   ;;  %s1619_s3 = inlined_call_operand.vmem [shape: f32[16,256], index: 3, kind: input, shape index: {}]   ;;  %s1620_s4 = inlined_call_operand.vmem [shape: f32[1,256], index: 4, kind: input, shape index: {}]   ;;  %s1621_s5 = inlined_call_operand.vmem [shape: f32[128,256], index: 5, kind: input, shape index: {}]   ;;  %s1622_s6 = inlined_call_operand.vmem [shape: f32[1,256], index: 6, kind: input, shape index: {}]   ;;  %s1623_s7 = inlined_call_operand.vmem [shape: f32[8,8,128], index: 7, kind: output, shape index: {}]  }
   0x1   :  { %29 = vst [vmem:[#allocation3] sm:$0xff] %v952_v0  ;;  %p860_p0 = scmp.le.s32.totalorder %s1616_s0, 0 }
   0x3   :  { %37 = sbr.rel (%p860_p0) target bundleno = 1472 (0x5c0), region = 33 }
   0x8   :  { %v1000_v1 = vld [vmem:[%s1621_s5 + $0xf0] sm:$0xff]  ;;  %v1005_v2 = vld [vmem:[%s1621_s5 + $0xe0] sm:$0xff]  ;;  %v1023_v5 = vld [vmem:[%s1621_s5 + $0xf8] sm:$0xff]  ;;  %v953_v9 = vmov 0   ;;  %vm84_vm0 = vcmask 130048  }
   0x9   :  { %237 = vmatpush.msra.mxu2 %v1000_v1  ;;  %v1011_v3 = vld [vmem:[%s1621_s5 + $0xd0] sm:$0xff]  ;;  %v1017_v4 = vld [vmem:[%s1621_s5 + $0xc0] sm:$0xff]  ;;  %257 = vmatpush.msra.mxu3 %v1023_v5  ;;  %v1034_v7 = vld [vmem:[%s1621_s5 + $0xe8] sm:$0xff] }
   0xa   :  { %v1028_v6 = vld [vmem:[%s1621_s5 + $0xb0] sm:$0xff]  ;;  %901 = vset.pattern.permute.xlu0 %v953_v9  ;;  %v1043_v10 = vld [vmem:[%s1621_s5 + $0xd8] sm:$0xff]  ;;  %v38_v11 = vld [vmem:[%s1619_s3] sm:$0xff]  ;;  %902 = vset.pattern.permute.xlu1 %v953_v9 }
   0xb   :  { %238 = vmatpush.msra.mxu2 %v1005_v2  ;;  %v40_v8 = vld [vmem:[%s1619_s3 + $0x10] sm:$0xff]  ;;  %v76_v12 = vld [vmem:[%s1617_s1] sm:$0xff]  ;;  %258 = vmatpush.msra.mxu3 %v1034_v7  ;;  %v1061_v14 = vld [vmem:[%s1621_s5 + $0xc8] sm:$0xff] }
   0xc   :  { %123 = vmatpush.msra.mxu0 %v40_v8  ;;  %v1054_v13 = vld [vmem:[%s1621_s5 + $0xa0] sm:$0xff]  ;;  %v1066_v15 = vld [vmem:[%s1621_s5 + $0x90] sm:$0xff]  ;;  %v1079_v17 = vld [vmem:[%s1621_s5 + $0xb8] sm:$0xff]  ;;  %903 = vset.pattern.permute.xlu2 %v953_v9 }
   0xd   :  { %239 = vmatpush.msra.mxu2 %v1011_v3  ;;  %259 = vmatpush.msra.mxu3 %v1043_v10  ;;  %v1074_v16 = vld [vmem:[%s1621_s5 + $0x80] sm:$0xff]  ;;  %v41_v18 = vld [vmem:[%s1619_s3 + $0x18] sm:$0xff]  ;;  %v39_v19 = vld [vmem:[%s1619_s3 + $0x8] sm:$0xff] }
   0xe   :  { %124 = vmatpush.msra.mxu0 %v38_v11  ;;  %v231_v20 = vld [vmem:[%s1618_s2] sm:$0xff]  ;;  %v1096_v21 = vld [vmem:[%s1621_s5 + $0xa8] sm:$0xff]  ;;  %164 = vmatpush.msra.mxu1 %v41_v18  ;;  %v1101_v22 = vld [vmem:[%s1621_s5 + $0x70] sm:$0xff] }
   0xf   :  { %240 = vmatpush.msra.mxu2 %v1017_v4  ;;  %861 = vmatmul.msk.f32.vlgmr.msra.gmra.mxu0 %vm84_vm0, %v76_v12  ;;  %v1108_v23 = vld [vmem:[%s1621_s5 + $0x98] sm:$0xff]  ;;  %v1113_v24 = vld [vmem:[%s1621_s5 + $0x60] sm:$0xff]  ;;  %v1121_v25 = vld [vmem:[%s1621_s5 + $0x88] sm:$0xff] }
  0x10   :  { %392 = vmatpush.msrb.mxu0 %v1000_v1  ;;  %260 = vmatpush.msra.mxu3 %v1061_v14  ;;  %v1127_v26 = vld [vmem:[%s1621_s5 + $0x50] sm:$0xff]  ;;  %v1135_v27 = vld [vmem:[%s1621_s5 + $0x78] sm:$0xff]  ;;  %v878_v28 = vld [vmem:[%s1618_s2 + $0x8] sm:$0xff] }
  0x11   :  { %241 = vmatpush.msra.mxu2 %v1028_v6  ;;  %303 = vperm.xlu0 %901, %v231_v20   ;;  %v1144_v29 = vld [vmem:[%s1621_s5 + $0x40] sm:$0xff]  ;;  %v1152_v30 = vld [vmem:[%s1621_s5 + $0x68] sm:$0xff]  ;;  %v1158_v31 = vld [vmem:[%s1621_s5 + $0x30] sm:$0xff] }
  0x12   :  { %261 = vmatpush.msra.mxu3 %v1079_v17  ;;  %165 = vmatpush.msra.mxu1 %v39_v19  ;;  %v1165_v32 = vld [vmem:[%s1621_s5 + $0x58] sm:$0xff]  ;;  %v1171_v33 = vld [vmem:[%s1621_s5 + $0x20] sm:$0xff]  ;;  %v1179_v34 = vld [vmem:[%s1621_s5 + $0x48] sm:$0xff] }
  0x13   :  { %242 = vmatpush.msra.mxu2 %v1054_v13  ;;  %869 = vmatmul.msk.f32.vlgmr.msra.gmra.mxu1 %vm84_vm0, %v76_v12  ;;  %v1185_v35 = vld [vmem:[%s1621_s5 + $0x10] sm:$0xff]  ;;  %v1193_v36 = vld [vmem:[%s1621_s5 + $0x38] sm:$0xff]  ;;  %v1202_v38 = vld [vmem:[%s1621_s5] sm:$0xff] }
  0x14   :  { %262 = vmatpush.msra.mxu3 %v1096_v21  ;;  %393 = vmatpush.msrb.mxu0 %v1005_v2  ;;  %v893_v37 = vld [vmem:[%s1618_s2 + $0x30] sm:$0xff]  ;;  %v1207_v39 = vld [vmem:[#allocation3] sm:$0xff]  ;;  %v1212_v40 = vld [vmem:[%s1621_s5 + $0x28] sm:$0xff] }
  0x15   :  { %243 = vmatpush.msra.mxu2 %v1066_v15  ;;  %412 = vmatpush.msrb.mxu1 %v1023_v5  ;;  %v1220_v41 = vld [vmem:[%s1621_s5 + $0x18] sm:$0xff]  ;;  %v1228_v42 = vld [vmem:[%s1621_s5 + $0x8] sm:$0xff]  ;;  %v74_v43 = vld [vmem:[%s1620_s4] sm:$0x3] }
  0x16   :  { %263 = vmatpush.msra.mxu3 %v1108_v23  ;;  %394 = vmatpush.msrb.mxu0 %v1011_v3  ;;  %v75_v44 = vld [vmem:[%s1622_s6] sm:$0x3]  ;;  %v1353_v45 = vperm.slane %v74_v43, 0  ;;  %v77_v55 = vld [vmem:[%s1617_s1 + $0x8] sm:$0xff]  ;;  %v1366_v0 = vperm.slane %v74_v43, 1 }
  0x17   :  { %244 = vmatpush.msra.mxu2 %v1074_v16  ;;  %413 = vmatpush.msrb.mxu1 %v1034_v7  ;;  %v1355_v47 = vperm.slane %v75_v44, 0  ;;  %v1364_v58 = vperm.slane %v75_v44, 1 }
  0x18   :  { %264 = vmatpush.msra.mxu3 %v1121_v25  ;;  %395 = vmatpush.msrb.mxu0 %v1017_v4 }
  0x19   :  { %245 = vmatpush.msra.mxu2 %v1101_v22  ;;  %380 = vperm.xlu0 %901, %v878_v28  }
  0x1a   :  { %265 = vmatpush.msra.mxu3 %v1135_v27  ;;  %396 = vmatpush.msrb.mxu0 %v1028_v6 }
  0x1b   :  { %246 = vmatpush.msra.mxu2 %v1113_v24  ;;  %414 = vmatpush.msrb.mxu1 %v1043_v10 }
  0x1c   :  { %266 = vmatpush.msra.mxu3 %v1152_v30  ;;  %397 = vmatpush.msrb.mxu0 %v1054_v13 }
  0x1d   :  { %247 = vmatpush.msra.mxu2 %v1127_v26  ;;  %415 = vmatpush.msrb.mxu1 %v1061_v14 }
  0x1e   :  { %267 = vmatpush.msra.mxu3 %v1165_v32  ;;  %398 = vmatpush.msrb.mxu0 %v1066_v15 }
  0x1f   :  { %248 = vmatpush.msra.mxu2 %v1144_v29  ;;  %416 = vmatpush.msrb.mxu1 %v1079_v17 }
  0x20   :  { %268 = vmatpush.msra.mxu3 %v1179_v34  ;;  %399 = vmatpush.msrb.mxu0 %v1074_v16 }
  0x21   :  { %249 = vmatpush.msra.mxu2 %v1158_v31  ;;  %770 = vperm.xlu0 %901, %v893_v37  }
  0x22   :  { %269 = vmatpush.msra.mxu3 %v1193_v36  ;;  %400 = vmatpush.msrb.mxu0 %v1101_v22 }
  0x23   :  { %250 = vmatpush.msra.mxu2 %v1171_v33  ;;  %417 = vmatpush.msrb.mxu1 %v1096_v21 }
  0x24   :  { %270 = vmatpush.msra.mxu3 %v1212_v40  ;;  %401 = vmatpush.msrb.mxu0 %v1113_v24 }
  0x25   :  { %251 = vmatpush.msra.mxu2 %v1185_v35  ;;  %418 = vmatpush.msrb.mxu1 %v1108_v23 }
  0x26   :  { %271 = vmatpush.msra.mxu3 %v1220_v41  ;;  %402 = vmatpush.msrb.mxu0 %v1127_v26 }
  0x27   :  { %252 = vmatpush.msra.mxu2 %v1202_v38  ;;  %419 = vmatpush.msrb.mxu1 %v1121_v25 }
  0x28   :  { %253 = vmatmul.f32.vlgmr.msra.gmra.mxu2 %v1207_v39  ;;  %272 = vmatpush.msra.mxu3 %v1228_v42 }
  0x29   :  { %314 = vmatpush.msrb.mxu2 %v1000_v1  ;;  %273 = vmatmul.f32.vlgmr.msra.gmra.mxu3 %v1207_v39 }
  0x2a   :  { %334 = vmatpush.msrb.mxu3 %v1023_v5  ;;  %403 = vmatpush.msrb.mxu0 %v1144_v29 }
  0x2b   :  { %315 = vmatpush.msrb.mxu2 %v1005_v2  ;;  %420 = vmatpush.msrb.mxu1 %v1135_v27 }
  0x2c   :  { %335 = vmatpush.msrb.mxu3 %v1034_v7  ;;  %404 = vmatpush.msrb.mxu0 %v1158_v31 }
  0x2d   :  { %316 = vmatpush.msrb.mxu2 %v1011_v3  ;;  %421 = vmatpush.msrb.mxu1 %v1152_v30 }
  0x2e   :  { %336 = vmatpush.msrb.mxu3 %v1043_v10  ;;  %405 = vmatpush.msrb.mxu0 %v1171_v33 }
  0x2f   :  { %317 = vmatpush.msrb.mxu2 %v1017_v4  ;;  %422 = vmatpush.msrb.mxu1 %v1165_v32 }
  0x30   :  { %337 = vmatpush.msrb.mxu3 %v1061_v14  ;;  %406 = vmatpush.msrb.mxu0 %v1185_v35 }
  0x31   :  { %318 = vmatpush.msrb.mxu2 %v1028_v6  ;;  %423 = vmatpush.msrb.mxu1 %v1179_v34 }
  0x32   :  { %338 = vmatpush.msrb.mxu3 %v1079_v17  ;;  %407 = vmatpush.msrb.mxu0 %v1202_v38 }
  0x33   :  { %319 = vmatpush.msrb.mxu2 %v1054_v13  ;;  %424 = vmatpush.msrb.mxu1 %v1193_v36 }
  0x34   :  { %339 = vmatpush.msrb.mxu3 %v1096_v21  ;;  %548 = vmatpush.msra.mxu0 %v1000_v1 }
  0x35   :  { %320 = vmatpush.msrb.mxu2 %v1066_v15  ;;  %425 = vmatpush.msrb.mxu1 %v1212_v40 }
  0x36   :  { %340 = vmatpush.msrb.mxu3 %v1108_v23  ;;  %549 = vmatpush.msra.mxu0 %v1005_v2 }
  0x37   :  { %321 = vmatpush.msrb.mxu2 %v1074_v16  ;;  %426 = vmatpush.msrb.mxu1 %v1220_v41 }
  0x38   :  { %341 = vmatpush.msrb.mxu3 %v1121_v25  ;;  %550 = vmatpush.msra.mxu0 %v1011_v3 }
  0x39   :  { %322 = vmatpush.msrb.mxu2 %v1101_v22  ;;  %427 = vmatpush.msrb.mxu1 %v1228_v42 }
  0x3a   :  { %342 = vmatpush.msrb.mxu3 %v1135_v27  ;;  %551 = vmatpush.msra.mxu0 %v1017_v4 }
  0x3b   :  { %323 = vmatpush.msrb.mxu2 %v1113_v24  ;;  %568 = vmatpush.msra.mxu1 %v1023_v5 }
  0x3c   :  { %343 = vmatpush.msrb.mxu3 %v1152_v30  ;;  %552 = vmatpush.msra.mxu0 %v1028_v6 }
  0x3d   :  { %324 = vmatpush.msrb.mxu2 %v1127_v26  ;;  %569 = vmatpush.msra.mxu1 %v1034_v7 }
  0x3e   :  { %344 = vmatpush.msrb.mxu3 %v1165_v32  ;;  %553 = vmatpush.msra.mxu0 %v1054_v13 }
  0x3f   :  { %325 = vmatpush.msrb.mxu2 %v1144_v29  ;;  %570 = vmatpush.msra.mxu1 %v1043_v10 }
  0x40   :  { %345 = vmatpush.msrb.mxu3 %v1179_v34  ;;  %554 = vmatpush.msra.mxu0 %v1066_v15 }
  0x41   :  { %326 = vmatpush.msrb.mxu2 %v1158_v31  ;;  %571 = vmatpush.msra.mxu1 %v1061_v14 }
  0x42   :  { %346 = vmatpush.msrb.mxu3 %v1193_v36  ;;  %555 = vmatpush.msra.mxu0 %v1074_v16 }
  0x43   :  { %327 = vmatpush.msrb.mxu2 %v1171_v33  ;;  %572 = vmatpush.msra.mxu1 %v1079_v17 }
  0x44   :  { %347 = vmatpush.msrb.mxu3 %v1212_v40  ;;  %556 = vmatpush.msra.mxu0 %v1101_v22 }
  0x45   :  { %328 = vmatpush.msrb.mxu2 %v1185_v35  ;;  %573 = vmatpush.msra.mxu1 %v1096_v21 }
  0x46   :  { %348 = vmatpush.msrb.mxu3 %v1220_v41  ;;  %557 = vmatpush.msra.mxu0 %v1113_v24 }
  0x47   :  { %329 = vmatpush.msrb.mxu2 %v1202_v38  ;;  %574 = vmatpush.msra.mxu1 %v1108_v23 }
  0x48   :  { %349 = vmatpush.msrb.mxu3 %v1228_v42  ;;  %558 = vmatpush.msra.mxu0 %v1127_v26 }
  0x49   :  { %470 = vmatpush.msra.mxu2 %v1000_v1  ;;  %575 = vmatpush.msra.mxu1 %v1121_v25 }
  0x4a   :  { %490 = vmatpush.msra.mxu3 %v1023_v5  ;;  %559 = vmatpush.msra.mxu0 %v1144_v29 }
  0x4b   :  { %471 = vmatpush.msra.mxu2 %v1005_v2  ;;  %576 = vmatpush.msra.mxu1 %v1135_v27 }
  0x4c   :  { %491 = vmatpush.msra.mxu3 %v1034_v7  ;;  %560 = vmatpush.msra.mxu0 %v1158_v31 }
  0x4d   :  { %472 = vmatpush.msra.mxu2 %v1011_v3  ;;  %577 = vmatpush.msra.mxu1 %v1152_v30 }
  0x4e   :  { %492 = vmatpush.msra.mxu3 %v1043_v10  ;;  %561 = vmatpush.msra.mxu0 %v1171_v33 }
  0x4f   :  { %473 = vmatpush.msra.mxu2 %v1017_v4  ;;  %578 = vmatpush.msra.mxu1 %v1165_v32 }
  0x50   :  { %493 = vmatpush.msra.mxu3 %v1061_v14  ;;  %562 = vmatpush.msra.mxu0 %v1185_v35 }
  0x51   :  { %474 = vmatpush.msra.mxu2 %v1028_v6  ;;  %579 = vmatpush.msra.mxu1 %v1179_v34 }
  0x52   :  { %494 = vmatpush.msra.mxu3 %v1079_v17  ;;  %563 = vmatpush.msra.mxu0 %v1202_v38 }
  0x53   :  { %475 = vmatpush.msra.mxu2 %v1054_v13  ;;  %580 = vmatpush.msra.mxu1 %v1193_v36 }
  0x54   :  { %495 = vmatpush.msra.mxu3 %v1096_v21  ;;  %862 = vmatmul.msk.f32.gmra.mxu0 %vm84_vm0, %v77_v55 }
  0x55   :  { %476 = vmatpush.msra.mxu2 %v1066_v15  ;;  %581 = vmatpush.msra.mxu1 %v1212_v40 }
  0x56   :  { %496 = vmatpush.msra.mxu3 %v1108_v23  ;;  %870 = vmatmul.msk.f32.gmra.mxu1 %vm84_vm0, %v77_v55 }
  0x57   :  { %477 = vmatpush.msra.mxu2 %v1074_v16  ;;  %582 = vmatpush.msra.mxu1 %v1220_v41 }
  0x58   :  { %497 = vmatpush.msra.mxu3 %v1121_v25 }
  0x59   :  { %478 = vmatpush.msra.mxu2 %v1101_v22  ;;  %583 = vmatpush.msra.mxu1 %v1228_v42 }
  0x5a   :  { %498 = vmatpush.msra.mxu3 %v1135_v27 }
  0x5b   :  { %479 = vmatpush.msra.mxu2 %v1113_v24 }
  0x5c   :  { %499 = vmatpush.msra.mxu3 %v1152_v30 }
  0x5d   :  { %480 = vmatpush.msra.mxu2 %v1127_v26 }
  0x5e   :  { %500 = vmatpush.msra.mxu3 %v1165_v32 }
  0x5f   :  { %481 = vmatpush.msra.mxu2 %v1144_v29 }
  0x60   :  { %501 = vmatpush.msra.mxu3 %v1179_v34 }
  0x61   :  { %482 = vmatpush.msra.mxu2 %v1158_v31 }
  0x62   :  { %502 = vmatpush.msra.mxu3 %v1193_v36 }
  0x63   :  { %483 = vmatpush.msra.mxu2 %v1171_v33 }
  0x64   :  { %503 = vmatpush.msra.mxu3 %v1212_v40 }
  0x65   :  { %484 = vmatpush.msra.mxu2 %v1185_v35 }
  0x66   :  { %504 = vmatpush.msra.mxu3 %v1220_v41 }
  0x67   :  { %485 = vmatpush.msra.mxu2 %v1202_v38 }
  0x68   :  { %505 = vmatpush.msra.mxu3 %v1228_v42 }
  0x83   :  { %v304_v43 = vpop.permute.xlu0 %303 }
  0x8c   :  { %v126_v46 = vpop.f32.mrf.mxu0 }
  0x8d   :  { %v196_v48 = vadd.f32 %v1353_v45, %v126_v46 }
  0x90   :  { %v167_v8 = vpop.f32.mrf.mxu1 }
  0x91   :  { %v197_v19 = vadd.f32 %v1366_v0, %v167_v8  ;;  %v881_v8 = vld [vmem:[%s1618_s2 + $0x10] sm:$0xff] }
  0x92   :  { %458 = vperm.xlu1 %902, %v881_v8  }
  0xab   :  { %v254_v49 = vpop.f32.mrf.mxu2 }
  0xac   :  { %v255_v50 = vadd.f32 %v254_v49, %v1355_v47  ;;  %v274_v60 = vpop.f32.mrf.mxu3 }
  0xad   :  { %v275_v9 = vadd.f32 %v274_v60, %v1364_v58 }
  0xae   :  { %v277_v51 = vadd.f32 %v255_v50, %v196_v48  ;;  %v79_v50 = vld [vmem:[%s1617_s1 + $0x18] sm:$0xff] }
  0xb0   :  { %v877_v52 = vmul.f32 -1.442695, %v277_v51  ;;  %v80_v51 = vld [vmem:[%s1617_s1 + $0x20] sm:$0xff] }
  0xb2   :  { %904 = vpow2.f32 %v877_v52  ;;  %v81_v52 = vld [vmem:[%s1617_s1 + $0x28] sm:$0xff] }
  0xb8   :  { %v905_v53 = vpop.eup %904 }
  0xb9   :  { %v281_v54 = vadd.f32 1.0, %v905_v53 }
  0xbb   :  { %906 = vrcp.f32 %v281_v54  ;;  %v293_v61 = vand.u32 2147483648, %v281_v54  ;;  %v291_v63 = vand.u32 2147483647, %v281_v54  ;;  %vm287_vm2 = vweird.f32 %v281_v54 }
  0xbd   :  { %v294_v12 = vor.u32 1.1754944e-38, %v293_v61  ;;  %vm292_vm4 = vcmp.eq.f32.partialorder %v291_v63, 8.507059e+37  ;;  %v83_v61 = vld [vmem:[%s1617_s1 + $0x38] sm:$0xff] }
  0xc1   :  { %v907_v56 = vpop.eup %906 }
  0xc2   :  { %v283_v57 = vmul.f32 %v907_v56, %v281_v54  ;;  %vm288_vm1 = vweird.f32 %v907_v56 }
  0xc3   :  { %vm289_vm3 = vmor %vm287_vm2, %vm288_vm1 }
  0xc4   :  { %v284_v59 = vsub.f32 1.0, %v283_v57  ;;  %v82_v57 = vld [vmem:[%s1617_s1 + $0x30] sm:$0xff] }
  0xc6   :  { %v285_v62 = vmul.f32 %v907_v56, %v284_v59 }
  0xc8   :  { %v286_v11 = vadd.f32 %v907_v56, %v285_v62 }
  0xca   :  { %v290_v18 = vsel %vm289_vm3, %v907_v56, %v286_v11 }
  0xcb   :  { %v295_v20 = vsel %vm292_vm4, %v294_v12, %v290_v18  ;;  %v884_v12 = vld [vmem:[%s1618_s2 + $0x18] sm:$0xff] }
  0xcc   :  { %v297_v28 = vmul.f32 %v295_v20, %v275_v9  ;;  %536 = vperm.xlu1 %902, %v884_v12  }
  0xce   :  { %v298_v37 = vadd.f32 %v297_v28, %v197_v19 }
  0xd0   :  { %908 = vtanh.f32 %v298_v37 }
  0xd1   :  { %v129_v53 = vpop.f32.mrf.mxu0 }
  0xd2   :  { %v198_v54 = vadd.f32 %v1353_v45, %v129_v53 }
  0xd6   :  { %v909_v44 = vpop.eup %908 }
  0xd7   :  { %v300_v46 = vsub.f32 %v909_v44, %v1207_v39  ;;  %v170_v44 = vpop.f32.mrf.mxu1 }
  0xd9   :  { %v306_v48 = vmul.f32 %v304_v43, %v300_v46 }
  0xdb   :  { %v1372_v49 = vadd.f32 %v306_v48, %v1207_v39  ;;  %v78_v39 = vld [vmem:[%s1617_s1 + $0x10] sm:$0xff] }
  0xdc   :  { %863 = vmatmul.msk.f32.gmra.mxu0 %vm84_vm0, %v78_v39  ;;  %871 = vmatmul.msk.f32.gmra.mxu1 %vm84_vm0, %v78_v39 }
  0xdd   :  { %308 = vst [vmem:[%s1623_s7] sm:$0xff] %v1372_v49  ;;  %330 = vmatmul.f32.vlgmr.msrb.gmra.mxu2 %v1372_v49  ;;  %350 = vmatmul.f32.vlgmr.msrb.gmra.mxu3 %v1372_v49 }
  0xde   :  { %626 = vmatpush.msrb.mxu2 %v1000_v1  ;;  %646 = vmatpush.msrb.mxu3 %v1023_v5 }
  0xe0   :  { %627 = vmatpush.msrb.mxu2 %v1005_v2  ;;  %647 = vmatpush.msrb.mxu3 %v1034_v7 }
  0xe2   :  { %628 = vmatpush.msrb.mxu2 %v1011_v3  ;;  %648 = vmatpush.msrb.mxu3 %v1043_v10 }
  0xe4   :  { %629 = vmatpush.msrb.mxu2 %v1017_v4  ;;  %649 = vmatpush.msrb.mxu3 %v1061_v14 }
  0xe5   :  { %864 = vmatmul.msk.f32.gmra.mxu0 %vm84_vm0, %v79_v50  ;;  %872 = vmatmul.msk.f32.gmra.mxu1 %vm84_vm0, %v79_v50  ;;  %v199_v50 = vadd.f32 %v1366_v0, %v170_v44 }
  0xe6   :  { %630 = vmatpush.msrb.mxu2 %v1028_v6  ;;  %650 = vmatpush.msrb.mxu3 %v1079_v17 }
  0xe8   :  { %631 = vmatpush.msrb.mxu2 %v1054_v13  ;;  %651 = vmatpush.msrb.mxu3 %v1096_v21 }
  0xea   :  { %632 = vmatpush.msrb.mxu2 %v1066_v15  ;;  %652 = vmatpush.msrb.mxu3 %v1108_v23 }
  0xec   :  { %633 = vmatpush.msrb.mxu2 %v1074_v16  ;;  %653 = vmatpush.msrb.mxu3 %v1121_v25 }
  0xed   :  { %865 = vmatmul.msk.f32.gmra.mxu0 %vm84_vm0, %v80_v51  ;;  %873 = vmatmul.msk.f32.gmra.mxu1 %vm84_vm0, %v80_v51 }
  0xee   :  { %634 = vmatpush.msrb.mxu2 %v1101_v22  ;;  %654 = vmatpush.msrb.mxu3 %v1135_v27 }
  0xf0   :  { %635 = vmatpush.msrb.mxu2 %v1113_v24  ;;  %655 = vmatpush.msrb.mxu3 %v1152_v30 }
  0xf2   :  { %636 = vmatpush.msrb.mxu2 %v1127_v26  ;;  %656 = vmatpush.msrb.mxu3 %v1165_v32 }
  0xf4   :  { %637 = vmatpush.msrb.mxu2 %v1144_v29  ;;  %657 = vmatpush.msrb.mxu3 %v1179_v34 }
  0xf5   :  { %866 = vmatmul.msk.f32.gmra.mxu0 %vm84_vm0, %v81_v52  ;;  %874 = vmatmul.msk.f32.gmra.mxu1 %vm84_vm0, %v81_v52  ;;  %v896_v52 = vld [vmem:[%s1618_s2 + $0x38] sm:$0xff] }
  0xf6   :  { %638 = vmatpush.msrb.mxu2 %v1158_v31  ;;  %658 = vmatpush.msrb.mxu3 %v1193_v36 }
  0xf7   :  { %848 = vperm.xlu1 %902, %v896_v52  }
  0xf8   :  { %639 = vmatpush.msrb.mxu2 %v1171_v33  ;;  %659 = vmatpush.msrb.mxu3 %v1212_v40 }
  0xfa   :  { %640 = vmatpush.msrb.mxu2 %v1185_v35  ;;  %660 = vmatpush.msrb.mxu3 %v1220_v41 }
  0xfc   :  { %641 = vmatpush.msrb.mxu2 %v1202_v38  ;;  %661 = vmatpush.msrb.mxu3 %v1228_v42 }
  0xfd   :  { %867 = vmatmul.msk.f32.gmra.mxu0 %vm84_vm0, %v82_v57  ;;  %875 = vmatmul.msk.f32.gmra.mxu1 %vm84_vm0, %v82_v57  ;;  %v381_v57 = vpop.permute.xlu0 %380 }
 0x105   :  { %868 = vmatmul.msk.f32.gmra.mxu0 %vm84_vm0, %v83_v61  ;;  %876 = vmatmul.msk.f32.gmra.mxu1 %vm84_vm0, %v83_v61 }
 0x160   :  { %v331_v55 = vpop.f32.mrf.mxu2  ;;  %v351_v37 = vpop.f32.mrf.mxu3 }
 0x161   :  { %v332_v56 = vadd.f32 %v331_v55, %v1355_v47  ;;  %v352_v48 = vadd.f32 %v351_v37, %v1364_v58 }
 0x163   :  { %v354_v59 = vadd.f32 %v332_v56, %v198_v54 }
 0x165   :  { %v879_v60 = vmul.f32 -1.442695, %v354_v59 }
 0x167   :  { %910 = vpow2.f32 %v879_v60 }
 0x16d   :  { %v911_v62 = vpop.eup %910 }
 0x16e   :  { %v358_v63 = vadd.f32 1.0, %v911_v62 }
 0x170   :  { %912 = vrcp.f32 %v358_v63  ;;  %v370_v19 = vand.u32 2147483648, %v358_v63  ;;  %v368_v28 = vand.u32 2147483647, %v358_v63  ;;  %vm364_vm6 = vweird.f32 %v358_v63 }
 0x172   :  { %v371_v43 = vor.u32 1.1754944e-38, %v370_v19  ;;  %vm369_vm8 = vcmp.eq.f32.partialorder %v368_v28, 8.507059e+37 }
 0x176   :  { %v913_v9 = vpop.eup %912 }
 0x177   :  { %v360_v11 = vmul.f32 %v913_v9, %v358_v63  ;;  %vm365_vm5 = vweird.f32 %v913_v9  ;;  %v173_v63 = vpop.f32.mrf.mxu1 }
 0x178   :  { %vm366_vm7 = vmor %vm364_vm6, %vm365_vm5 }
 0x179   :  { %v361_v18 = vsub.f32 1.0, %v360_v11 }
 0x17b   :  { %v362_v20 = vmul.f32 %v913_v9, %v361_v18 }
 0x17d   :  { %v363_v46 = vadd.f32 %v913_v9, %v362_v20 }
 0x17f   :  { %v367_v39 = vsel %vm366_vm7, %v913_v9, %v363_v46  ;;  %v1503_v9 = vpop.f32.mrf.mxu1 }
 0x180   :  { %v372_v51 = vsel %vm369_vm8, %v371_v43, %v367_v39 }
 0x181   :  { %v374_v53 = vmul.f32 %v372_v51, %v352_v48 }
 0x183   :  { %v375_v54 = vadd.f32 %v374_v53, %v199_v50 }
 0x185   :  { %914 = vtanh.f32 %v375_v54 }
 0x187   :  { %v1507_v12 = vpop.f32.mrf.mxu1 }
 0x18b   :  { %v915_v55 = vpop.eup %914 }
 0x18c   :  { %v377_v56 = vsub.f32 %v915_v55, %v1372_v49 }
 0x18e   :  { %v383_v59 = vmul.f32 %v381_v57, %v377_v56 }
 0x18f   :  { %v1511_v19 = vpop.f32.mrf.mxu1 }
 0x190   :  { %v1457_v60 = vadd.f32 %v383_v59, %v1372_v49  ;;  %v132_v49 = vpop.f32.mrf.mxu0 }
 0x191   :  { %v200_v28 = vadd.f32 %v1353_v45, %v132_v49 }
 0x192   :  { %880 = vst [vmem:[%s1623_s7 + $0x8] sm:$0xff] %v1457_v60  ;;  %408 = vmatmul.f32.vlgmr.msrb.gmra.mxu0 %v1457_v60  ;;  %428 = vmatmul.f32.vlgmr.msrb.gmra.mxu1 %v1457_v60 }
 0x193   :  { %704 = vmatpush.msrb.mxu0 %v1000_v1  ;;  %724 = vmatpush.msrb.mxu1 %v1023_v5 }
 0x195   :  { %705 = vmatpush.msrb.mxu0 %v1005_v2  ;;  %725 = vmatpush.msrb.mxu1 %v1034_v7 }
 0x197   :  { %706 = vmatpush.msrb.mxu0 %v1011_v3  ;;  %726 = vmatpush.msrb.mxu1 %v1043_v10  ;;  %v1515_v43 = vpop.f32.mrf.mxu1 }
 0x198   :  { %v1497_v61 = vpop.f32.mrf.mxu0 }
 0x199   :  { %707 = vmatpush.msrb.mxu0 %v1017_v4  ;;  %727 = vmatpush.msrb.mxu1 %v1061_v14 }
 0x19b   :  { %708 = vmatpush.msrb.mxu0 %v1028_v6  ;;  %728 = vmatpush.msrb.mxu1 %v1079_v17 }
 0x19d   :  { %709 = vmatpush.msrb.mxu0 %v1054_v13  ;;  %729 = vmatpush.msrb.mxu1 %v1096_v21 }
 0x19f   :  { %710 = vmatpush.msrb.mxu0 %v1066_v15  ;;  %730 = vmatpush.msrb.mxu1 %v1108_v23  ;;  %v1517_v50 = vpop.f32.mrf.mxu1 }
 0x1a0   :  { %v1499_v62 = vpop.f32.mrf.mxu0  ;;  %1625 = vst [vmem:[#allocation7_spill] sm:$0xff] %v1517_v50  ;;  %v459_v50 = vpop.permute.xlu1 %458 }
 0x1a1   :  { %711 = vmatpush.msrb.mxu0 %v1074_v16  ;;  %731 = vmatpush.msrb.mxu1 %v1121_v25 }
 0x1a3   :  { %712 = vmatpush.msrb.mxu0 %v1101_v22  ;;  %732 = vmatpush.msrb.mxu1 %v1135_v27 }
 0x1a5   :  { %713 = vmatpush.msrb.mxu0 %v1113_v24  ;;  %733 = vmatpush.msrb.mxu1 %v1152_v30 }
 0x1a7   :  { %714 = vmatpush.msrb.mxu0 %v1127_v26  ;;  %734 = vmatpush.msrb.mxu1 %v1165_v32 }
 0x1a8   :  { %v1501_v8 = vpop.f32.mrf.mxu0 }
 0x1a9   :  { %715 = vmatpush.msrb.mxu0 %v1144_v29  ;;  %735 = vmatpush.msrb.mxu1 %v1179_v34 }
 0x1ab   :  { %716 = vmatpush.msrb.mxu0 %v1158_v31  ;;  %736 = vmatpush.msrb.mxu1 %v1193_v36 }
 0x1ad   :  { %717 = vmatpush.msrb.mxu0 %v1171_v33  ;;  %737 = vmatpush.msrb.mxu1 %v1212_v40 }
 0x1af   :  { %718 = vmatpush.msrb.mxu0 %v1185_v35  ;;  %738 = vmatpush.msrb.mxu1 %v1220_v41 }
 0x1b0   :  { %v1505_v11 = vpop.f32.mrf.mxu0 }
 0x1b1   :  { %719 = vmatpush.msrb.mxu0 %v1202_v38  ;;  %739 = vmatpush.msrb.mxu1 %v1228_v42 }
 0x1b8   :  { %v1509_v18 = vpop.f32.mrf.mxu0 }
 0x1b9   :  { %1624 = vst [vmem:[#allocation6_spill] sm:$0xff] %v1509_v18 }
 0x20f   :  { %v409_v20 = vpop.f32.mrf.mxu0  ;;  %v429_v57 = vpop.f32.mrf.mxu1 }
 0x210   :  { %v410_v37 = vadd.f32 %v409_v20, %v1355_v47  ;;  %v430_v20 = vadd.f32 %v429_v57, %v1364_v58 }
 0x212   :  { %v432_v44 = vadd.f32 %v410_v37, %v200_v28 }
 0x214   :  { %v882_v46 = vmul.f32 -1.442695, %v432_v44  ;;  %v201_v44 = vadd.f32 %v1366_v0, %v173_v63 }
 0x216   :  { %916 = vpow2.f32 %v882_v46 }
 0x21c   :  { %v917_v48 = vpop.eup %916 }
 0x21d   :  { %v436_v39 = vadd.f32 1.0, %v917_v48 }
 0x21f   :  { %918 = vrcp.f32 %v436_v39  ;;  %v448_v54 = vand.u32 2147483648, %v436_v39  ;;  %v446_v56 = vand.u32 2147483647, %v436_v39  ;;  %vm442_vm10 = vweird.f32 %v436_v39 }
 0x221   :  { %v449_v49 = vor.u32 1.1754944e-38, %v448_v54  ;;  %vm447_vm12 = vcmp.eq.f32.partialorder %v446_v56, 8.507059e+37 }
 0x225   :  { %v919_v51 = vpop.eup %918 }
 0x226   :  { %v438_v52 = vmul.f32 %v919_v51, %v436_v39  ;;  %vm443_vm9 = vweird.f32 %v919_v51 }
 0x227   :  { %vm444_vm11 = vmor %vm442_vm10, %vm443_vm9 }
 0x228   :  { %v439_v53 = vsub.f32 1.0, %v438_v52 }
 0x22a   :  { %v440_v55 = vmul.f32 %v919_v51, %v439_v53 }
 0x22c   :  { %v441_v59 = vadd.f32 %v919_v51, %v440_v55 }
 0x22e   :  { %v445_v28 = vsel %vm444_vm11, %v919_v51, %v441_v59 }
 0x22f   :  { %v450_v37 = vsel %vm447_vm12, %v449_v49, %v445_v28 }
 0x230   :  { %v452_v46 = vmul.f32 %v450_v37, %v430_v20  ;;  %v205_v37 = vadd.f32 %v1366_v0, %v1507_v12 }
 0x232   :  { %v453_v48 = vadd.f32 %v452_v46, %v201_v44 }
 0x234   :  { %920 = vtanh.f32 %v453_v48 }
 0x23a   :  { %v921_v52 = vpop.eup %920 }
 0x23b   :  { %v455_v53 = vsub.f32 %v921_v52, %v1457_v60 }
 0x23d   :  { %v461_v18 = vmul.f32 %v459_v50, %v455_v53 }
 0x23f   :  { %v1523_v55 = vadd.f32 %v461_v18, %v1457_v60 }
 0x241   :  { %883 = vst [vmem:[%s1623_s7 + $0x10] sm:$0xff] %v1523_v55  ;;  %486 = vmatmul.f32.vlgmr.msra.gmra.mxu2 %v1523_v55  ;;  %506 = vmatmul.f32.vlgmr.msra.gmra.mxu3 %v1523_v55 }
 0x242   :  { %782 = vmatpush.msra.mxu2 %v1000_v1  ;;  %802 = vmatpush.msra.mxu3 %v1023_v5 }
 0x244   :  { %783 = vmatpush.msra.mxu2 %v1005_v2  ;;  %803 = vmatpush.msra.mxu3 %v1034_v7  ;;  %v202_v2 = vadd.f32 %v1353_v45, %v1497_v61 }
 0x246   :  { %784 = vmatpush.msra.mxu2 %v1011_v3  ;;  %804 = vmatpush.msra.mxu3 %v1043_v10  ;;  %v887_v10 = vld [vmem:[%s1618_s2 + $0x20] sm:$0xff] }
 0x247   :  { %614 = vperm.xlu2 %903, %v887_v10  }
 0x248   :  { %785 = vmatpush.msra.mxu2 %v1017_v4  ;;  %805 = vmatpush.msra.mxu3 %v1061_v14 }
 0x24a   :  { %786 = vmatpush.msra.mxu2 %v1028_v6  ;;  %806 = vmatpush.msra.mxu3 %v1079_v17 }
 0x24c   :  { %787 = vmatpush.msra.mxu2 %v1054_v13  ;;  %807 = vmatpush.msra.mxu3 %v1096_v21 }
 0x24e   :  { %788 = vmatpush.msra.mxu2 %v1066_v15  ;;  %808 = vmatpush.msra.mxu3 %v1108_v23  ;;  %v890_v15 = vld [vmem:[%s1618_s2 + $0x28] sm:$0xff] }
 0x24f   :  { %692 = vperm.xlu2 %903, %v890_v15  }
 0x250   :  { %789 = vmatpush.msra.mxu2 %v1074_v16  ;;  %809 = vmatpush.msra.mxu3 %v1121_v25 }
 0x252   :  { %790 = vmatpush.msra.mxu2 %v1101_v22  ;;  %810 = vmatpush.msra.mxu3 %v1135_v27 }
 0x254   :  { %791 = vmatpush.msra.mxu2 %v1113_v24  ;;  %811 = vmatpush.msra.mxu3 %v1152_v30  ;;  %v203_v30 = vadd.f32 %v1366_v0, %v1503_v9 }
 0x256   :  { %792 = vmatpush.msra.mxu2 %v1127_v26  ;;  %812 = vmatpush.msra.mxu3 %v1165_v32 }
 0x258   :  { %793 = vmatpush.msra.mxu2 %v1144_v29  ;;  %813 = vmatpush.msra.mxu3 %v1179_v34 }
 0x25a   :  { %794 = vmatpush.msra.mxu2 %v1158_v31  ;;  %814 = vmatpush.msra.mxu3 %v1193_v36 }
 0x25c   :  { %795 = vmatpush.msra.mxu2 %v1171_v33  ;;  %815 = vmatpush.msra.mxu3 %v1212_v40 }
 0x25e   :  { %796 = vmatpush.msra.mxu2 %v1185_v35  ;;  %816 = vmatpush.msra.mxu3 %v1220_v41  ;;  %v537_v35 = vpop.permute.xlu1 %536  ;;  %v204_v41 = vadd.f32 %v1353_v45, %v1499_v62 }
 0x260   :  { %797 = vmatpush.msra.mxu2 %v1202_v38  ;;  %817 = vmatpush.msra.mxu3 %v1228_v42 }
 0x2a1   :  { %v615_v53 = vpop.permute.xlu2 %614 }
 0x2c4   :  { %v487_v1 = vpop.f32.mrf.mxu2  ;;  %v507_v23 = vpop.f32.mrf.mxu3 }
 0x2c5   :  { %v488_v3 = vadd.f32 %v487_v1, %v1355_v47  ;;  %v508_v26 = vadd.f32 %v507_v23, %v1364_v58 }
 0x2c7   :  { %v510_v4 = vadd.f32 %v488_v3, %v202_v2  ;;  %v206_v3 = vadd.f32 %v1353_v45, %v1501_v8 }
 0x2c9   :  { %v885_v5 = vmul.f32 -1.442695, %v510_v4 }
 0x2cb   :  { %922 = vpow2.f32 %v885_v5 }
 0x2d1   :  { %v923_v6 = vpop.eup %922 }
 0x2d2   :  { %v514_v7 = vadd.f32 1.0, %v923_v6 }
 0x2d4   :  { %924 = vrcp.f32 %v514_v7  ;;  %v526_v17 = vand.u32 2147483648, %v514_v7  ;;  %v524_v22 = vand.u32 2147483647, %v514_v7  ;;  %vm520_vm14 = vweird.f32 %v514_v7 }
 0x2d6   :  { %v527_v25 = vor.u32 1.1754944e-38, %v526_v17  ;;  %vm525_vm0 = vcmp.eq.f32.partialorder %v524_v22, 8.507059e+37 }
 0x2da   :  { %v925_v13 = vpop.eup %924 }
 0x2db   :  { %v516_v14 = vmul.f32 %v925_v13, %v514_v7  ;;  %vm521_vm13 = vweird.f32 %v925_v13 }
 0x2dc   :  { %vm522_vm15 = vmor %vm520_vm14, %vm521_vm13 }
 0x2dd   :  { %v517_v16 = vsub.f32 1.0, %v516_v14 }
 0x2df   :  { %v518_v21 = vmul.f32 %v925_v13, %v517_v16 }
 0x2e1   :  { %v519_v24 = vadd.f32 %v925_v13, %v518_v21 }
 0x2e3   :  { %v523_v27 = vsel %vm522_vm15, %v925_v13, %v519_v24 }
 0x2e4   :  { %v528_v29 = vsel %vm525_vm0, %v527_v25, %v523_v27 }
 0x2e5   :  { %v530_v31 = vmul.f32 %v528_v29, %v508_v26  ;;  %v207_v26 = vadd.f32 %v1366_v0, %v1511_v19 }
 0x2e7   :  { %v531_v32 = vadd.f32 %v530_v31, %v203_v30 }
 0x2e9   :  { %926 = vtanh.f32 %v531_v32  ;;  %v693_v32 = vpop.permute.xlu2 %692 }
 0x2ef   :  { %v927_v33 = vpop.eup %926 }
 0x2f0   :  { %v533_v34 = vsub.f32 %v927_v33, %v1523_v55 }
 0x2f2   :  { %v539_v36 = vmul.f32 %v537_v35, %v533_v34 }
 0x2f4   :  { %v540_v38 = vadd.f32 %v539_v36, %v1523_v55  ;;  %v208_v36 = vadd.f32 %v1353_v45, %v1505_v11 }
 0x2f6   :  { %886 = vst [vmem:[%s1623_s7 + $0x18] sm:$0xff] %v540_v38  ;;  %564 = vmatmul.f32.vlgmr.msra.gmra.mxu0 %v540_v38  ;;  %584 = vmatmul.f32.vlgmr.msra.gmra.mxu1 %v540_v38 }
 0x373   :  { %v565_v40 = vpop.f32.mrf.mxu0  ;;  %v585_v57 = vpop.f32.mrf.mxu1 }
 0x374   :  { %v566_v42 = vadd.f32 %v565_v40, %v1355_v47  ;;  %v586_v49 = vadd.f32 %v585_v57, %v1364_v58 }
 0x376   :  { %v588_v60 = vadd.f32 %v566_v42, %v204_v41 }
 0x378   :  { %v888_v61 = vmul.f32 -1.442695, %v588_v60 }
 0x37a   :  { %928 = vpow2.f32 %v888_v61 }
 0x380   :  { %v929_v63 = vpop.eup %928 }
 0x381   :  { %v592_v9 = vadd.f32 1.0, %v929_v63 }
 0x383   :  { %930 = vrcp.f32 %v592_v9  ;;  %v604_v51 = vand.u32 2147483648, %v592_v9  ;;  %v602_v56 = vand.u32 2147483647, %v592_v9  ;;  %vm598_vm2 = vweird.f32 %v592_v9 }
 0x385   :  { %v605_v62 = vor.u32 1.1754944e-38, %v604_v51  ;;  %vm603_vm4 = vcmp.eq.f32.partialorder %v602_v56, 8.507059e+37 }
 0x389   :  { %v931_v18 = vpop.eup %930 }
 0x38a   :  { %v594_v39 = vmul.f32 %v931_v18, %v592_v9  ;;  %vm599_vm1 = vweird.f32 %v931_v18 }
 0x38b   :  { %vm600_vm3 = vmor %vm598_vm2, %vm599_vm1 }
 0x38c   :  { %v595_v50 = vsub.f32 1.0, %v594_v39 }
 0x38e   :  { %v596_v54 = vmul.f32 %v931_v18, %v595_v50 }
 0x390   :  { %v597_v59 = vadd.f32 %v931_v18, %v596_v54 }
 0x392   :  { %v601_v20 = vsel %vm600_vm3, %v931_v18, %v597_v59  ;;  %v209_v59 = vadd.f32 %v1366_v0, %v1515_v43 }
 0x393   :  { %v606_v28 = vsel %vm603_vm4, %v605_v62, %v601_v20 }
 0x394   :  { %v608_v44 = vmul.f32 %v606_v28, %v586_v49 }
 0x396   :  { %v609_v46 = vadd.f32 %v608_v44, %v205_v37  ;;  %v771_v37 = vpop.permute.xlu0 %770 }
 0x398   :  { %932 = vtanh.f32 %v609_v46 }
 0x39e   :  { %v933_v48 = vpop.eup %932 }
 0x39f   :  { %v611_v52 = vsub.f32 %v933_v48, %v540_v38 }
 0x3a1   :  { %v617_v55 = vmul.f32 %v615_v53, %v611_v52  ;;  %v1626_v52 = vld [vmem:[#allocation6_spill] sm:$0xff] }
 0x3a2   :  { %v210_v53 = vadd.f32 %v1353_v45, %v1626_v52 }
 0x3a3   :  { %v618_v1 = vadd.f32 %v617_v55, %v540_v38 }
 0x3a5   :  { %889 = vst [vmem:[%s1623_s7 + $0x20] sm:$0xff] %v618_v1  ;;  %642 = vmatmul.f32.vlgmr.msrb.gmra.mxu2 %v618_v1  ;;  %662 = vmatmul.f32.vlgmr.msrb.gmra.mxu3 %v618_v1 }
 0x428   :  { %v643_v2 = vpop.f32.mrf.mxu2  ;;  %v663_v21 = vpop.f32.mrf.mxu3 }
 0x429   :  { %v644_v12 = vadd.f32 %v643_v2, %v1355_v47  ;;  %v664_v23 = vadd.f32 %v663_v21, %v1364_v58 }
 0x42b   :  { %v666_v4 = vadd.f32 %v644_v12, %v206_v3 }
 0x42d   :  { %v891_v5 = vmul.f32 -1.442695, %v666_v4 }
 0x42f   :  { %934 = vpow2.f32 %v891_v5 }
 0x435   :  { %v935_v6 = vpop.eup %934 }
 0x436   :  { %v670_v7 = vadd.f32 1.0, %v935_v6 }
 0x438   :  { %936 = vrcp.f32 %v670_v7  ;;  %v682_v15 = vand.u32 2147483648, %v670_v7  ;;  %v680_v17 = vand.u32 2147483647, %v670_v7  ;;  %vm676_vm6 = vweird.f32 %v670_v7 }
 0x43a   :  { %v683_v8 = vor.u32 1.1754944e-38, %v682_v15  ;;  %vm681_vm8 = vcmp.eq.f32.partialorder %v680_v17, 8.507059e+37  ;;  %v1627_v17 = vld [vmem:[#allocation7_spill] sm:$0xff] }
 0x43b   :  { %v211_v21 = vadd.f32 %v1366_v0, %v1627_v17 }
 0x43e   :  { %v937_v10 = vpop.eup %936 }
 0x43f   :  { %v672_v13 = vmul.f32 %v937_v10, %v670_v7  ;;  %vm677_vm5 = vweird.f32 %v937_v10 }
 0x440   :  { %vm678_vm7 = vmor %vm676_vm6, %vm677_vm5 }
 0x441   :  { %v673_v14 = vsub.f32 1.0, %v672_v13 }
 0x443   :  { %v674_v16 = vmul.f32 %v937_v10, %v673_v14 }
 0x445   :  { %v675_v22 = vadd.f32 %v937_v10, %v674_v16 }
 0x447   :  { %v679_v24 = vsel %vm678_vm7, %v937_v10, %v675_v22 }
 0x448   :  { %v684_v25 = vsel %vm681_vm8, %v683_v8, %v679_v24 }
 0x449   :  { %v686_v27 = vmul.f32 %v684_v25, %v664_v23  ;;  %v849_v25 = vpop.permute.xlu1 %848 }
 0x44b   :  { %v687_v29 = vadd.f32 %v686_v27, %v207_v26 }
 0x44d   :  { %938 = vtanh.f32 %v687_v29 }
 0x453   :  { %v939_v30 = vpop.eup %938 }
 0x454   :  { %v689_v31 = vsub.f32 %v939_v30, %v618_v1 }
 0x456   :  { %v695_v33 = vmul.f32 %v693_v32, %v689_v31 }
 0x458   :  { %v696_v34 = vadd.f32 %v695_v33, %v618_v1 }
 0x45a   :  { %892 = vst [vmem:[%s1623_s7 + $0x28] sm:$0xff] %v696_v34  ;;  %720 = vmatmul.f32.vlgmr.msrb.gmra.mxu0 %v696_v34  ;;  %740 = vmatmul.f32.vlgmr.msrb.gmra.mxu1 %v696_v34 }
 0x4d7   :  { %v721_v35 = vpop.f32.mrf.mxu0  ;;  %v741_v50 = vpop.f32.mrf.mxu1 }
 0x4d8   :  { %v722_v19 = vadd.f32 %v721_v35, %v1355_v47  ;;  %v742_v54 = vadd.f32 %v741_v50, %v1364_v58 }
 0x4da   :  { %v744_v38 = vadd.f32 %v722_v19, %v208_v36 }
 0x4dc   :  { %v894_v40 = vmul.f32 -1.442695, %v744_v38 }
 0x4de   :  { %940 = vpow2.f32 %v894_v40 }
 0x4e4   :  { %v941_v41 = vpop.eup %940 }
 0x4e5   :  { %v748_v42 = vadd.f32 1.0, %v941_v41 }
 0x4e7   :  { %942 = vrcp.f32 %v748_v42  ;;  %v760_v9 = vand.u32 2147483648, %v748_v42  ;;  %v758_v39 = vand.u32 2147483647, %v748_v42  ;;  %vm754_vm10 = vweird.f32 %v748_v42 }
 0x4e9   :  { %v761_v11 = vor.u32 1.1754944e-38, %v760_v9  ;;  %vm759_vm12 = vcmp.eq.f32.partialorder %v758_v39, 8.507059e+37 }
 0x4ed   :  { %v943_v60 = vpop.eup %942 }
 0x4ee   :  { %v750_v61 = vmul.f32 %v943_v60, %v748_v42  ;;  %vm755_vm9 = vweird.f32 %v943_v60 }
 0x4ef   :  { %vm756_vm11 = vmor %vm754_vm10, %vm755_vm9 }
 0x4f0   :  { %v751_v63 = vsub.f32 1.0, %v750_v61 }
 0x4f2   :  { %v752_v18 = vmul.f32 %v943_v60, %v751_v63 }
 0x4f4   :  { %v753_v51 = vadd.f32 %v943_v60, %v752_v18 }
 0x4f6   :  { %v757_v56 = vsel %vm756_vm11, %v943_v60, %v753_v51 }
 0x4f7   :  { %v762_v57 = vsel %vm759_vm12, %v761_v11, %v757_v56 }
 0x4f8   :  { %v764_v62 = vmul.f32 %v762_v57, %v742_v54 }
 0x4fa   :  { %v765_v49 = vadd.f32 %v764_v62, %v209_v59 }
 0x4fc   :  { %944 = vtanh.f32 %v765_v49 }
 0x502   :  { %v945_v20 = vpop.eup %944 }
 0x503   :  { %v767_v28 = vsub.f32 %v945_v20, %v696_v34 }
 0x505   :  { %v773_v44 = vmul.f32 %v771_v37, %v767_v28 }
 0x507   :  { %v774_v46 = vadd.f32 %v773_v44, %v696_v34 }
 0x509   :  { %895 = vst [vmem:[%s1623_s7 + $0x30] sm:$0xff] %v774_v46  ;;  %798 = vmatmul.f32.vlgmr.msra.gmra.mxu2 %v774_v46  ;;  %818 = vmatmul.f32.vlgmr.msra.gmra.mxu3 %v774_v46 }
 0x58c   :  { %v799_v48 = vpop.f32.mrf.mxu2  ;;  %v819_v13 = vpop.f32.mrf.mxu3 }
 0x58d   :  { %v800_v43 = vadd.f32 %v799_v48, %v1355_v47  ;;  %v820_v47 = vadd.f32 %v819_v13, %v1364_v58 }
 0x58f   :  { %v822_v55 = vadd.f32 %v800_v43, %v210_v53 }
 0x591   :  { %v897_v1 = vmul.f32 -1.442695, %v822_v55 }
 0x593   :  { %946 = vpow2.f32 %v897_v1 }
 0x599   :  { %v947_v2 = vpop.eup %946 }
 0x59a   :  { %v826_v3 = vadd.f32 1.0, %v947_v2 }
 0x59c   :  { %948 = vrcp.f32 %v826_v3  ;;  %v838_v6 = vand.u32 2147483648, %v826_v3  ;;  %v836_v10 = vand.u32 2147483647, %v826_v3  ;;  %vm832_vm14 = vweird.f32 %v826_v3 }
 0x59e   :  { %v839_v45 = vor.u32 1.1754944e-38, %v838_v6  ;;  %vm837_vm0 = vcmp.eq.f32.partialorder %v836_v10, 8.507059e+37 }
 0x5a2   :  { %v949_v12 = vpop.eup %948 }
 0x5a3   :  { %v828_v4 = vmul.f32 %v949_v12, %v826_v3  ;;  %vm833_vm13 = vweird.f32 %v949_v12 }
 0x5a4   :  { %vm834_vm15 = vmor %vm832_vm14, %vm833_vm13 }
 0x5a5   :  { %v829_v5 = vsub.f32 1.0, %v828_v4 }
 0x5a7   :  { %v830_v7 = vmul.f32 %v949_v12, %v829_v5 }
 0x5a9   :  { %v831_v14 = vadd.f32 %v949_v12, %v830_v7 }
 0x5ab   :  { %v835_v15 = vsel %vm834_vm15, %v949_v12, %v831_v14 }
 0x5ac   :  { %v840_v16 = vsel %vm837_vm0, %v839_v45, %v835_v15 }
 0x5ad   :  { %v842_v22 = vmul.f32 %v840_v16, %v820_v47 }
 0x5af   :  { %v843_v8 = vadd.f32 %v842_v22, %v211_v21 }
 0x5b1   :  { %950 = vtanh.f32 %v843_v8 }
 0x5b7   :  { %v951_v23 = vpop.eup %950 }
 0x5b8   :  { %v845_v24 = vsub.f32 %v951_v23, %v774_v46 }
 0x5ba   :  { %v851_v26 = vmul.f32 %v849_v25, %v845_v24 }
 0x5bc   :  { %v852_v27 = vadd.f32 %v851_v26, %v774_v46 }
 0x5be   :  { %898 = vst [vmem:[%s1623_s7 + $0x38] sm:$0xff] %v852_v27 }
 0x5bf   :  { %855 = vst [vmem:[#allocation3] sm:$0xff] %v852_v27 }
 0x5c0 PF:  {}

</bundles_post_ra>
